<compile_context>
chip_gen: v7x
topology: tpu7x:2x2x1
jax: 0.10.0
libtpu: 0.0.40
codegen_flags: <defaults>
</compile_context>

<pallas_src>
import jax
import jax.numpy as jnp
from jax.experimental import pallas as pl
from jax.experimental.pallas import tpu as pltpu

EPS = 1e-5


def _round_up(x, m):
    return (x + m - 1) // m * m


def _make_kernel(m_rows, mxu_dtype):
    inv_m = 1.0 / float(m_rows)

    def kernel(x_ref, gamma_ref, beta_ref, w_ref, o_ref):
        x = x_ref[...]                                       # (M, Cin_p) f32
        # --- BatchNorm2d batch statistics, single pass over x (per channel) ---
        s1 = jnp.sum(x, axis=0, keepdims=True)               # (1, Cin_p)
        s2 = jnp.sum(x * x, axis=0, keepdims=True)           # (1, Cin_p)
        mean = s1 * inv_m
        var = s2 * inv_m - mean * mean                       # biased variance
        scale = gamma_ref[...] * jax.lax.rsqrt(var + EPS)    # (1, Cin_p)
        shift = beta_ref[...] - mean * scale                 # (1, Cin_p)
        # Padded channels carry gamma=beta=0 -> scale=shift=0, contribute nothing.

        # --- fold the BN affine into the 1x1-conv weight ---
        w = w_ref[...]                                       # (Cin_p, Cout_p) f32
        w_scaled = w * scale.T                               # per-input-channel scale
        bias = jnp.dot(shift, w, preferred_element_type=jnp.float32)  # (1, Cout_p)

        o = jnp.dot(x.astype(mxu_dtype), w_scaled.astype(mxu_dtype),
                    preferred_element_type=jnp.float32)      # f32 accumulation
        o_ref[...] = o + bias

    return kernel


def batchnorm_conv2d(x_nchw, gamma, beta, w_oihw,
                     mxu_dtype=jnp.bfloat16, return_nhwc=False):
    N, C, H, W = x_nchw.shape
    Cout = w_oihw.shape[0]
    M = N * H * W
    Cin_p = _round_up(C, 128)
    Cout_p = _round_up(Cout, 128)

    # NCHW -> (M, Cin), zero-pad channels to a lane-dense 128 multiple.
    x2d = jnp.transpose(x_nchw, (0, 2, 3, 1)).reshape(M, C).astype(jnp.float32)
    x2d = jnp.pad(x2d, ((0, 0), (0, Cin_p - C)))
    # conv weight (Cout, Cin, 1, 1) -> (Cin, Cout), zero-padded to (Cin_p, Cout_p).
    w2d = w_oihw.reshape(Cout, C).T.astype(jnp.float32)
    w2d = jnp.pad(w2d, ((0, Cin_p - C), (0, Cout_p - Cout)))
    g2d = jnp.pad(gamma.astype(jnp.float32), (0, Cin_p - C)).reshape(1, Cin_p)
    b2d = jnp.pad(beta.astype(jnp.float32), (0, Cin_p - C)).reshape(1, Cin_p)

    cost = pl.CostEstimate(
        flops=2 * M * Cin_p * Cout_p,
        transcendentals=Cin_p,
        bytes_accessed=4 * (M * Cin_p + Cin_p * Cout_p + M * Cout_p),
    )

    out2d = pl.pallas_call(
        _make_kernel(M, mxu_dtype),
        out_shape=jax.ShapeDtypeStruct((M, Cout_p), jnp.float32),
        in_specs=[
            pl.BlockSpec(memory_space=pltpu.MemorySpace.VMEM),  # x2d   (M, Cin_p)
            pl.BlockSpec(memory_space=pltpu.MemorySpace.VMEM),  # gamma (1, Cin_p)
            pl.BlockSpec(memory_space=pltpu.MemorySpace.VMEM),  # beta  (1, Cin_p)
            pl.BlockSpec(memory_space=pltpu.MemorySpace.VMEM),  # w2d   (Cin_p, Cout_p)
        ],
        out_specs=pl.BlockSpec(memory_space=pltpu.MemorySpace.VMEM),
        cost_estimate=cost,
    )(x2d, g2d, b2d, w2d)

    out_nhwc = out2d[:, :Cout].reshape(N, H, W, Cout)
    if return_nhwc:
        # Graph-level layout escape hatch: lets a following 1x1-conv/BN layer
        # consume channels-last directly and skip the NCHW round-trip.
        return out_nhwc
    return jnp.transpose(out_nhwc, (0, 3, 1, 2))


def reference(x_nchw, gamma, beta, w_oihw):
    mean = jnp.mean(x_nchw, axis=(0, 2, 3), keepdims=True)
    var = jnp.mean((x_nchw - mean) ** 2, axis=(0, 2, 3), keepdims=True)
    xhat = (x_nchw - mean) * jax.lax.rsqrt(var + EPS)
    xbn = xhat * gamma[None, :, None, None] + beta[None, :, None, None]
    w2d = w_oihw.reshape(w_oihw.shape[0], w_oihw.shape[1])
    return jnp.einsum('nchw,oc->nohw', xbn, w2d)


if __name__ == "__main__":
    key = jax.random.PRNGKey(0)
    k_x, k_g, k_b, k_w = jax.random.split(key, 4)

    N, Cin, H, W, Cout = 1, 112, 14, 14, 672

    x159 = jax.random.normal(k_x, (N, Cin, H, W), dtype=jnp.float32)
    gamma = jax.random.normal(k_g, (Cin,), dtype=jnp.float32) * 0.1 + 1.0
    beta = jax.random.normal(k_b, (Cin,), dtype=jnp.float32) * 0.1
    w = jax.random.normal(k_w, (Cout, Cin, 1, 1), dtype=jnp.float32) * 0.05

    ref = reference(x159, gamma, beta, w)

    # Exact-path check (f32 MXU operands) against tight tolerance.
    out_f32 = batchnorm_conv2d(x159, gamma, beta, w, mxu_dtype=jnp.float32)
    jax.block_until_ready(out_f32)
    assert out_f32.shape == (N, Cout, H, W), out_f32.shape
    assert jnp.allclose(out_f32, ref, atol=1e-3, rtol=1e-3), "f32 path mismatch"

    # Optimized path: bf16 MXU operands with f32 accumulation (default).
    out = batchnorm_conv2d(x159, gamma, beta, w)
    jax.block_until_ready(out)
    assert out.shape == (N, Cout, H, W), out.shape
    assert jnp.allclose(out, ref, atol=2e-2, rtol=2e-2), "bf16 path mismatch"

    print("KERNEL_OK")
</pallas_src>

<mosaic_0001>
module attributes {stable_mosaic.version = 11 : i64} {
  func.func @kernel(%arg0: memref<196x128xf32, #tpu.memory_space<vmem>>, %arg1: memref<1x128xf32, #tpu.memory_space<vmem>>, %arg2: memref<1x128xf32, #tpu.memory_space<vmem>>, %arg3: memref<128x768xf32, #tpu.memory_space<vmem>>, %arg4: memref<196x768xf32, #tpu.memory_space<vmem>>) attributes {dimension_semantics = [], scalar_prefetch = 0 : i64, scratch_operands = 0 : i64, tpu.core_type = #tpu.core_type<tc>} {
    %c0 = arith.constant 0 : index
    %c0_0 = arith.constant 0 : index
    %0 = vector.load %arg0[%c0, %c0_0] : memref<196x128xf32, #tpu.memory_space<vmem>>, vector<196x128xf32>
    %cst = arith.constant dense<0.000000e+00> : vector<128xf32>
    %1 = vector.multi_reduction <add>, %0, %cst [0] : vector<196x128xf32> to vector<128xf32>
    %2 = vector.shape_cast %1 : vector<128xf32> to vector<1x128xf32>
    %3 = arith.mulf %0, %0 : vector<196x128xf32>
    %cst_1 = arith.constant dense<0.000000e+00> : vector<128xf32>
    %4 = vector.multi_reduction <add>, %3, %cst_1 [0] : vector<196x128xf32> to vector<128xf32>
    %5 = vector.shape_cast %4 : vector<128xf32> to vector<1x128xf32>
    %cst_2 = arith.constant 0.00510204071 : f32
    %6 = vector.broadcast %cst_2 : f32 to vector<1x128xf32>
    %7 = arith.mulf %2, %6 : vector<1x128xf32>
    %cst_3 = arith.constant 0.00510204071 : f32
    %8 = vector.broadcast %cst_3 : f32 to vector<1x128xf32>
    %9 = arith.mulf %5, %8 : vector<1x128xf32>
    %10 = arith.mulf %7, %7 : vector<1x128xf32>
    %11 = arith.subf %9, %10 : vector<1x128xf32>
    %c0_4 = arith.constant 0 : index
    %c0_5 = arith.constant 0 : index
    %12 = vector.load %arg1[%c0_4, %c0_5] : memref<1x128xf32, #tpu.memory_space<vmem>>, vector<1x128xf32>
    %cst_6 = arith.constant 9.99999974E-6 : f32
    %13 = vector.broadcast %cst_6 : f32 to vector<1x128xf32>
    %14 = arith.addf %11, %13 : vector<1x128xf32>
    %15 = math.rsqrt %14 : vector<1x128xf32>
    %16 = arith.mulf %12, %15 : vector<1x128xf32>
    %c0_7 = arith.constant 0 : index
    %c0_8 = arith.constant 0 : index
    %17 = vector.load %arg2[%c0_7, %c0_8] : memref<1x128xf32, #tpu.memory_space<vmem>>, vector<1x128xf32>
    %18 = arith.mulf %7, %16 : vector<1x128xf32>
    %19 = arith.subf %17, %18 : vector<1x128xf32>
    %c0_9 = arith.constant 0 : index
    %c0_10 = arith.constant 0 : index
    %20 = vector.load %arg3[%c0_9, %c0_10] : memref<128x768xf32, #tpu.memory_space<vmem>>, vector<128x768xf32>
    %21 = tpu.transpose %16, [1, 0] : vector<1x128xf32> -> vector<128x1xf32>
    %22 = vector.broadcast %21 : vector<128x1xf32> to vector<128x768xf32>
    %23 = arith.mulf %20, %22 : vector<128x768xf32>
    %cst_11 = arith.constant dense<0.000000e+00> : vector<1x768xf32>
    %24 = tpu.matmul %19, %20, %cst_11 {dimension_numbers = #tpu.dot_dimension_numbers<[1], [0], [0], [1], [0, 0, 1, 1], [], []>} : vector<1x128xf32>, vector<128x768xf32>, vector<1x768xf32> -> vector<1x768xf32>
    %cst_12 = arith.constant dense<0.000000e+00> : vector<196x768xf32>
    %25 = tpu.matmul %0, %23, %cst_12 {dimension_numbers = #tpu.dot_dimension_numbers<[1], [0], [0], [1], [0, 0, 1, 1], [], []>} : vector<196x128xf32>, vector<128x768xf32>, vector<196x768xf32> -> vector<196x768xf32>
    %26 = vector.broadcast %24 : vector<1x768xf32> to vector<196x768xf32>
    %27 = arith.addf %25, %26 : vector<196x768xf32>
    %c0_13 = arith.constant 0 : index
    %c0_14 = arith.constant 0 : index
    %28 = vector.load %arg4[%c0_13, %c0_14] : memref<196x768xf32, #tpu.memory_space<vmem>>, vector<196x768xf32>
    tpu.vector_store %arg4[%c0_13, %c0_14], %27 {strides = array<i32>} : memref<196x768xf32, #tpu.memory_space<vmem>>, vector<196x768xf32>,
    return
  }
}

</mosaic_0001>

<bundles_post_ra>
// kernel: tpu_custom_call.1
= control target key start
LH: loop header
LB: loop body
LE: loop exit
PB: predicated region body
PF: predicated region fallthrough
CT: control target
= control target key end

     0   :  { %9 = vsyncpa [#allocation3], 0  ;;  %s2796_s0 = inlined_call_operand.hbm [shape: f32[196,128], index: 0, kind: input, shape index: {}]   ;;  %s2797_s1 = inlined_call_operand.vmem [shape: f32[1,128], index: 1, kind: input, shape index: {}]   ;;  %s2798_s2 = inlined_call_operand.vmem [shape: f32[1,128], index: 2, kind: input, shape index: {}]   ;;  %s2799_s3 = inlined_call_operand.hbm [shape: f32[128,768], index: 3, kind: input, shape index: {}]   ;;  %s2800_s4 = inlined_call_operand.hbm [shape: f32[196,768], index: 4, kind: output, shape index: {}]  }
   0x1   :  { %10 = vsyncpa [#allocation6], 0 }
   0x2   :  { %11 = vsyncpa [#allocation4], 0  ;;  %s1826_s15 = smov [#allocation2]   ;;  %s1754_s19 = scalar_lea.hbm %s2796_s0, 3200 }
   0x3   :  { %s17_s16 = sshll.u32 %s1826_s15, 4  ;;  %p1755_p0 = scmp.ne.s32.totalorder %s2796_s0, %s1754_s19  ;;  %s18_s16 = int_to_ptr.vmem [resolvable:$true] %s17_s16 }
   0x4   :  { %p1758_p1 = scmp.lt.u32.totalorder %s1754_s19, %s2796_s0 }
   0x6   :  { %p1760_p2 = pnand %p1758_p1, %p1755_p0 }
   0x8   :  { %1763 = shalt.err (!%p1760_p2)
}
   0x9   :  { %s1764_s24 = scalar_lea.vmem %s18_s16, 3200  ;;  %p1769_p4 = scmp.lt.s32.totalorder %s18_s16, %s18_s16 }
   0xa   :  { %p1765_p3 = scmp.ne.s32.totalorder %s18_s16, %s1764_s24  ;;  %p1770_p5 = scmp.lt.s32.totalorder %s1764_s24, %s1764_s24 }
   0xc   :  { %p1771_p6 = por %p1770_p5, %p1769_p4 }
   0xe   :  { %p1772_p7 = pnand %p1771_p6, %p1765_p3 }
  0x10   :  { %1775 = shalt.err (!%p1772_p7)
}
  0x11   :  { %s1827_s25 = smov 128   ;;  %s1828_s26 = smov 8  }
  0x12   :  { %23 = dma.hbm_to_vmem [thread:$0]  %s2796_s0, 3200, %s18_s16, [#allocation3], %s1827_s25, %s1827_s25, %s1828_s26  }
  0x13   :  { %s1829_s29 = smov [#allocation5]   ;;  %s1776_s7 = scalar_lea.hbm %s2799_s3, 12288 }
  0x14   :  { %s33_s30 = sshll.u32 %s1829_s29, 4  ;;  %p1777_p8 = scmp.ne.s32.totalorder %s2799_s3, %s1776_s7  ;;  %s34_s30 = int_to_ptr.vmem [resolvable:$true] %s33_s30 }
  0x15   :  { %p1780_p9 = scmp.lt.u32.totalorder %s1776_s7, %s2799_s3 }
  0x17   :  { %p1782_p10 = pnand %p1780_p9, %p1777_p8 }
  0x19   :  { %1785 = shalt.err (!%p1782_p10)
}
  0x1a   :  { %s1786_s12 = scalar_lea.vmem %s34_s30, 12288  ;;  %p1791_p12 = scmp.lt.s32.totalorder %s34_s30, %s34_s30 }
  0x1b   :  { %p1787_p11 = scmp.ne.s32.totalorder %s34_s30, %s1786_s12  ;;  %p1792_p13 = scmp.lt.s32.totalorder %s1786_s12, %s1786_s12 }
  0x1d   :  { %p1793_p0 = por %p1792_p13, %p1791_p12 }
  0x1f   :  { %p1794_p1 = pnand %p1793_p0, %p1787_p11 }
  0x21   :  { %1797 = shalt.err (!%p1794_p1)
}
  0x22   :  { %s1830_s0 = smov 768   ;;  %s1831_s13 = smov 48  }
  0x23   :  { %39 = dma.hbm_to_vmem [thread:$0]  %s2799_s3, 12288, %s34_s30, [#allocation6], %s1830_s0, %s1830_s0, %s1831_s13  }
  0x24   :  { %1820 = dma.done.wait [#allocation3], 3200  }
  0x25   :  { %1821 = vsyncadd [#allocation3], 4294964096 }
  0x26   :  { %1822 = dma.done.wait [#allocation6], 12288  }
  0x27   :  { %1823 = vsyncadd [#allocation6], 4294955008  ;;  %v1832_v0 = vmov 0   ;;  %v46_v1 = vld [vmem:[#allocation2] sm:$0xff]  ;;  %v47_v2 = vld [vmem:[#allocation2 + $0x8] sm:$0xff]  ;;  %vm94_vm0 = vcmask 1043456  }
  0x28   :  { %1726 = vset.pattern.permute.xlu1 %v1832_v0  ;;  %v48_v3 = vld [vmem:[#allocation2 + $0x10] sm:$0xff]  ;;  %v49_v4 = vld [vmem:[#allocation2 + $0x18] sm:$0xff]  ;;  %v71_v5 = vadd.f32 %v47_v2, %v46_v1  ;;  %v103_v6 = vmul.f32 %v46_v1, %v46_v1  ;;  %v104_v7 = vmul.f32 %v47_v2, %v47_v2  ;;  %v50_v9 = vld [vmem:[#allocation2 + $0x20] sm:$0xff] }
  0x29   :  { %v105_v8 = vmul.f32 %v48_v3, %v48_v3  ;;  %v106_v11 = vmul.f32 %v49_v4, %v49_v4  ;;  %v51_v13 = vld [vmem:[#allocation2 + $0x28] sm:$0xff]  ;;  %v107_v15 = vmul.f32 %v50_v9, %v50_v9  ;;  %v52_v17 = vld [vmem:[#allocation2 + $0x30] sm:$0xff]  ;;  %v53_v21 = vld [vmem:[#allocation2 + $0x38] sm:$0xff] }
  0x2a   :  { %v72_v10 = vadd.f32 %v71_v5, %v48_v3  ;;  %v128_v12 = vadd.f32 %v104_v7, %v103_v6  ;;  %v108_v19 = vmul.f32 %v51_v13, %v51_v13  ;;  %v109_v23 = vmul.f32 %v52_v17, %v52_v17  ;;  %v54_v25 = vld [vmem:[#allocation2 + $0x40] sm:$0xff]  ;;  %v55_v29 = vld [vmem:[#allocation2 + $0x48] sm:$0xff]  ;;  %v56_v33 = vld [vmem:[#allocation2 + $0x50] sm:$0xff] }
  0x2b   :  { %v110_v27 = vmul.f32 %v53_v21, %v53_v21  ;;  %v111_v31 = vmul.f32 %v54_v25, %v54_v25  ;;  %v112_v35 = vmul.f32 %v55_v29, %v55_v29  ;;  %v57_v37 = vld [vmem:[#allocation2 + $0x58] sm:$0xff]  ;;  %v113_v39 = vmul.f32 %v56_v33, %v56_v33  ;;  %v58_v41 = vld [vmem:[#allocation2 + $0x60] sm:$0xff]  ;;  %v59_v45 = vld [vmem:[#allocation2 + $0x68] sm:$0xff] }
  0x2c   :  { %v73_v14 = vadd.f32 %v72_v10, %v49_v4  ;;  %v129_v16 = vadd.f32 %v128_v12, %v105_v8  ;;  %v114_v43 = vmul.f32 %v57_v37, %v57_v37  ;;  %v115_v47 = vmul.f32 %v58_v41, %v58_v41  ;;  %v60_v49 = vld [vmem:[#allocation2 + $0x70] sm:$0xff]  ;;  %v61_v53 = vld [vmem:[#allocation2 + $0x78] sm:$0xff]  ;;  %v62_v57 = vld [vmem:[#allocation2 + $0x80] sm:$0xff] }
  0x2d   :  { %v116_v51 = vmul.f32 %v59_v45, %v59_v45  ;;  %v117_v55 = vmul.f32 %v60_v49, %v60_v49  ;;  %v118_v59 = vmul.f32 %v61_v53, %v61_v53  ;;  %v63_v61 = vld [vmem:[#allocation2 + $0x88] sm:$0xff]  ;;  %v119_v63 = vmul.f32 %v62_v57, %v62_v57  ;;  %v64_v2 = vld [vmem:[#allocation2 + $0x90] sm:$0xff]  ;;  %v65_v6 = vld [vmem:[#allocation2 + $0x98] sm:$0xff] }
  0x2e   :  { %v74_v18 = vadd.f32 %v73_v14, %v50_v9  ;;  %v130_v20 = vadd.f32 %v129_v16, %v106_v11  ;;  %v120_v4 = vmul.f32 %v63_v61, %v63_v61  ;;  %v121_v8 = vmul.f32 %v64_v2, %v64_v2  ;;  %v66_v10 = vld [vmem:[#allocation2 + $0xa0] sm:$0xff]  ;;  %v67_v14 = vld [vmem:[#allocation2 + $0xa8] sm:$0xff] }
  0x2f   :  { %v122_v12 = vmul.f32 %v65_v6, %v65_v6  ;;  %v123_v16 = vmul.f32 %v66_v10, %v66_v10 }
  0x30   :  { %v75_v22 = vadd.f32 %v74_v18, %v51_v13  ;;  %v131_v24 = vadd.f32 %v130_v20, %v107_v15  ;;  %v68_v18 = vld [vmem:[#allocation2 + $0xb0] sm:$0xff]  ;;  %v70_v20 = vld [vmem:[#allocation2 + $0xc0] sm:$0xf] }
  0x32   :  { %v76_v26 = vadd.f32 %v75_v22, %v52_v17  ;;  %v132_v28 = vadd.f32 %v131_v24, %v108_v19 }
  0x34   :  { %v77_v30 = vadd.f32 %v76_v26, %v53_v21  ;;  %v133_v32 = vadd.f32 %v132_v28, %v109_v23  ;;  %v124_v21 = vmul.f32 %v67_v14, %v67_v14  ;;  %v69_v23 = vld [vmem:[#allocation2 + $0xb8] sm:$0xff]  ;;  %v127_v28 = vmul.f32 %v70_v20, %v70_v20 }
  0x36   :  { %v78_v34 = vadd.f32 %v77_v30, %v54_v25  ;;  %v134_v36 = vadd.f32 %v133_v32, %v110_v27  ;;  %v125_v25 = vmul.f32 %v68_v18, %v68_v18  ;;  %v126_v30 = vmul.f32 %v69_v23, %v69_v23 }
  0x38   :  { %v79_v38 = vadd.f32 %v78_v34, %v55_v29  ;;  %v135_v40 = vadd.f32 %v134_v36, %v111_v31  ;;  %v95_v29 = vsel %vm94_vm0, %v70_v20, 0.0  ;;  %v1944_v20 = vld [vmem:[#allocation5 + $0x1b8] sm:$0xff] }
  0x3a   :  { %v80_v42 = vadd.f32 %v79_v38, %v56_v33  ;;  %v136_v44 = vadd.f32 %v135_v40, %v112_v35  ;;  %v151_v35 = vsel %vm94_vm0, %v127_v28, 0.0  ;;  %v1960_v28 = vld [vmem:[#allocation5 + $0x1e0] sm:$0xff] }
  0x3c   :  { %v81_v46 = vadd.f32 %v80_v42, %v57_v37  ;;  %v137_v48 = vadd.f32 %v136_v44, %v113_v39 }
  0x3e   :  { %v82_v50 = vadd.f32 %v81_v46, %v58_v41  ;;  %v138_v52 = vadd.f32 %v137_v48, %v114_v43 }
  0x40   :  { %v83_v54 = vadd.f32 %v82_v50, %v59_v45  ;;  %v139_v56 = vadd.f32 %v138_v52, %v115_v47 }
  0x42   :  { %v84_v58 = vadd.f32 %v83_v54, %v60_v49  ;;  %v140_v60 = vadd.f32 %v139_v56, %v116_v51 }
  0x44   :  { %v85_v62 = vadd.f32 %v84_v58, %v61_v53  ;;  %v141_v1 = vadd.f32 %v140_v60, %v117_v55  ;;  %v163_v55 = vld [vmem:[%s2797_s1] sm:$0x1] }
  0x45   :  { %v1895_v60 = vld [vmem:[#allocation5 + $0x38] sm:$0xff] }
  0x46   :  { %v86_v3 = vadd.f32 %v85_v62, %v62_v57  ;;  %v142_v5 = vadd.f32 %v141_v1, %v118_v59  ;;  %v1893_v59 = vld [vmem:[#allocation5 + $0x8] sm:$0xff]  ;;  %v1899_v62 = vld [vmem:[#allocation5] sm:$0xff] }
  0x48   :  { %v87_v7 = vadd.f32 %v86_v3, %v63_v61  ;;  %v143_v9 = vadd.f32 %v142_v5, %v119_v63  ;;  %v1524_v61 = vpack.c.bf16 %v1895_v60, %v1893_v59  ;;  %v1901_v63 = vld [vmem:[#allocation5 + $0x30] sm:$0xff]  ;;  %v1908_v3 = vld [vmem:[#allocation5 + $0x98] sm:$0xff]  ;;  %v1912_v5 = vld [vmem:[#allocation5 + $0x60] sm:$0xff] }
  0x49   :  { %v1526_v1 = vpack.c.bf16 %v1901_v63, %v1899_v62 }
  0x4a   :  { %v88_v11 = vadd.f32 %v87_v7, %v64_v2  ;;  %v144_v13 = vadd.f32 %v143_v9, %v120_v4  ;;  %1525 = vmatprep.subr.bf16.mxu0 %v1524_v61  ;;  %v1906_v2 = vld [vmem:[#allocation5 + $0x68] sm:$0xff] }
  0x4b   :  { %1527 = vmatpush1.bf16.msra.mxu0 %v1526_v1  ;;  %v1528_v4 = vpack.c.bf16 %v1908_v3, %v1906_v2  ;;  %v2022_v61 = vld [vmem:[#allocation5 + $0x108] sm:$0xff] }
  0x4c   :  { %v89_v15 = vadd.f32 %v88_v11, %v65_v6  ;;  %v145_v17 = vadd.f32 %v144_v13, %v121_v8  ;;  %v1914_v6 = vld [vmem:[#allocation5 + $0x90] sm:$0xff]  ;;  %v1918_v8 = vld [vmem:[#allocation5 + $0xc8] sm:$0xff] }
  0x4d   :  { %v1530_v7 = vpack.c.bf16 %v1914_v6, %v1912_v5  ;;  %1529 = vmatprep.subr.bf16.mxu0 %v1528_v4  ;;  %v1926_v11 = vld [vmem:[#allocation5 + $0xf0] sm:$0xff]  ;;  %v1930_v13 = vld [vmem:[#allocation5 + $0x128] sm:$0xff] }
  0x4e   :  { %v90_v19 = vadd.f32 %v89_v15, %v66_v10  ;;  %v146_v22 = vadd.f32 %v145_v17, %v122_v12  ;;  %v1924_v10 = vld [vmem:[#allocation5 + $0xc0] sm:$0xff]  ;;  %v1938_v17 = vld [vmem:[#allocation5 + $0x150] sm:$0xff] }
  0x4f   :  { %1531 = vmatpush1.bf16.msra.mxu0 %v1530_v7  ;;  %v1534_v12 = vpack.c.bf16 %v1926_v11, %v1924_v10  ;;  %v2030_v4 = vld [vmem:[#allocation5 + $0xd0] sm:$0xff]  ;;  %v2032_v7 = vld [vmem:[#allocation5 + $0x100] sm:$0xff] }
  0x50   :  { %v91_v24 = vadd.f32 %v90_v19, %v67_v14  ;;  %v147_v26 = vadd.f32 %v146_v22, %v123_v16  ;;  %v1932_v14 = vld [vmem:[#allocation5 + $0x158] sm:$0xff]  ;;  %v1936_v16 = vld [vmem:[#allocation5 + $0x120] sm:$0xff]  ;;  %v1942_v19 = vld [vmem:[#allocation5 + $0x188] sm:$0xff] }
  0x51   :  { %v1536_v15 = vpack.c.bf16 %v1932_v14, %v1930_v13  ;;  %v1948_v22 = vld [vmem:[#allocation5 + $0x180] sm:$0xff] }
  0x52   :  { %v92_v27 = vadd.f32 %v91_v24, %v68_v18  ;;  %v148_v31 = vadd.f32 %v147_v26, %v124_v21  ;;  %v1538_v18 = vpack.c.bf16 %v1938_v17, %v1936_v16  ;;  %v1540_v21 = vpack.c.bf16 %v1944_v20, %v1942_v19  ;;  %v1956_v26 = vld [vmem:[#allocation5 + $0x218] sm:$0xff] }
  0x54   :  { %v93_v32 = vadd.f32 %v92_v27, %v69_v23  ;;  %v149_v33 = vadd.f32 %v148_v31, %v125_v25  ;;  %v1950_v23 = vld [vmem:[#allocation5 + $0x1b0] sm:$0xff]  ;;  %v1954_v25 = vld [vmem:[#allocation5 + $0x1e8] sm:$0xff] }
  0x55   :  { %v1542_v24 = vpack.c.bf16 %v1950_v23, %v1948_v22  ;;  %v1544_v27 = vpack.c.bf16 %v1956_v26, %v1954_v25  ;;  %v1966_v31 = vld [vmem:[#allocation5 + $0x248] sm:$0xff] }
  0x56   :  { %v96_v34 = vadd.f32 %v95_v29, %v93_v32  ;;  %v150_v36 = vadd.f32 %v149_v33, %v126_v30  ;;  %v1962_v29 = vld [vmem:[#allocation5 + $0x210] sm:$0xff]  ;;  %v1968_v32 = vld [vmem:[#allocation5 + $0x278] sm:$0xff]  ;;  %v1970_v33 = vld [vmem:[#allocation5 + $0x240] sm:$0xff] }
  0x57   :  { %v1546_v30 = vpack.c.bf16 %v1962_v29, %v1960_v28  ;;  %2848 = vst [vmem:[#allocation11_spill] sm:$0xff] %v1968_v32  ;;  %2849 = vst [vmem:[#allocation12_spill] sm:$0xff] %v1970_v33 }
  0x58   :  { %v97_v37 = vrot.slane %v96_v34, 4  ;;  %v152_v38 = vadd.f32 %v151_v35, %v150_v36  ;;  %v1974_v35 = vld [vmem:[#allocation5 + $0x270] sm:$0xff]  ;;  %v1976_v36 = vld [vmem:[#allocation5 + $0x2a8] sm:$0xff] }
  0x59   :  { %2850 = vst [vmem:[#allocation13_spill] sm:$0xff] %v1974_v35  ;;  %2851 = vst [vmem:[#allocation14_spill] sm:$0xff] %v1976_v36 }
  0x5a   :  { %v98_v39 = vadd.f32 %v97_v37, %v96_v34  ;;  %v153_v40 = vrot.slane %v152_v38, 4  ;;  %v1548_v34 = vpack.c.bf16 %v1968_v32, %v1966_v31  ;;  %v1978_v37 = vld [vmem:[#allocation5 + $0x2d8] sm:$0xff] }
  0x5b   :  { %2852 = vst [vmem:[#allocation15_spill] sm:$0xff] %v1978_v37  ;;  %v2096_v32 = vld [vmem:[#allocation5 + $0x58] sm:$0xff] }
  0x5c   :  { %v99_v41 = vrot.slane %v98_v39, 2  ;;  %v154_v42 = vadd.f32 %v153_v40, %v152_v38  ;;  %v2801_v38 = vmov 0.0   ;;  %v1552_v40 = vpack.c.bf16 %v1978_v37, %v1976_v36  ;;  %v2084_v37 = vld [vmem:[#allocation5 + $0x2e8] sm:$0xff]  ;;  %2864 = vst [vmem:[#allocation27_spill] sm:$0xff] %v2096_v32 }
  0x5d   :  { %538 = vmatprep.mubr.f32.mxu0 %v2801_v38  ;;  %775 = vmatprep.mubr.f32.mxu1 %v2801_v38  ;;  %2860 = vst [vmem:[#allocation23_spill] sm:$0xff] %v2084_v37 }
  0x5e   :  { %v100_v43 = vadd.f32 %v99_v41, %v98_v39  ;;  %v155_v44 = vrot.slane %v154_v42, 2  ;;  %v1550_v39 = vpack.c.bf16 %v1974_v35, %v1970_v33  ;;  %v1985_v41 = vld [vmem:[#allocation5 + $0x2a0] sm:$0xff] }
  0x5f   :  { %2853 = vst [vmem:[#allocation16_spill] sm:$0xff] %v1985_v41  ;;  %v2092_v35 = vld [vmem:[#allocation5 + $0x2e0] sm:$0xff] }
  0x60   :  { %v101_v45 = vrot.slane %v100_v43, 1  ;;  %v156_v46 = vadd.f32 %v155_v44, %v154_v42  ;;  %v1987_v42 = vld [vmem:[#allocation5 + $0x2d0] sm:$0xff]  ;;  %v1992_v44 = vld [vmem:[#allocation5 + $0x48] sm:$0xff]  ;;  %2862 = vst [vmem:[#allocation25_spill] sm:$0xff] %v2092_v35 }
  0x61   :  { %2854 = vst [vmem:[#allocation17_spill] sm:$0xff] %v1987_v42 }
  0x62   :  { %v102_v47 = vadd.f32 %v101_v45, %v100_v43  ;;  %v157_v48 = vrot.slane %v156_v46, 1  ;;  %v1990_v43 = vld [vmem:[#allocation5 + $0x18] sm:$0xff]  ;;  %v1554_v45 = vpack.c.bf16 %v1987_v42, %v1985_v41  ;;  %v2080_v42 = vld [vmem:[#allocation5 + $0x280] sm:$0xff] }
  0x63   :  { %2858 = vst [vmem:[#allocation21_spill] sm:$0xff] %v2080_v42  ;;  %v2082_v41 = vld [vmem:[#allocation5 + $0x2b8] sm:$0xff] }
  0x64   :  { %v159_v49 = vmul.f32 0.0051020407, %v102_v47  ;;  %v158_v50 = vadd.f32 %v157_v48, %v156_v46  ;;  %v167_v46 = vld [vmem:[%s2798_s2] sm:$0x1]  ;;  %v1556_v47 = vpack.c.bf16 %v1992_v44, %v1990_v43  ;;  %v2001_v48 = vld [vmem:[#allocation5 + $0x10] sm:$0xff]  ;;  %2859 = vst [vmem:[#allocation22_spill] sm:$0xff] %v2082_v41 }
  0x65   :  { %s1834_s2 = smov [#allocation7]  }
  0x66   :  { %v161_v51 = vmul.f32 %v159_v49, %v159_v49  ;;  %v160_v52 = vmul.f32 0.0051020407, %v158_v50  ;;  %v2005_v50 = vld [vmem:[#allocation5 + $0x78] sm:$0xff]  ;;  %s1511_s18 = sshll.u32 %s1834_s2, 4  ;;  %s1512_s18 = int_to_ptr.vmem [resolvable:$true] %s1511_s18 }
  0x67   :  { %s1798_s19 = scalar_lea.vmem %s1512_s18, 19200  ;;  %p1803_p3 = scmp.lt.s32.totalorder %s1512_s18, %s1512_s18 }
  0x68   :  { %v162_v53 = vsub.f32 %v160_v52, %v161_v51  ;;  %v2007_v51 = vld [vmem:[#allocation5 + $0xa8] sm:$0xff]  ;;  %p1799_p2 = scmp.ne.s32.totalorder %s1512_s18, %s1798_s19  ;;  %p1804_p4 = scmp.lt.s32.totalorder %s1798_s19, %s1798_s19 }
  0x6a   :  { %v164_v54 = vadd.f32 1e-05, %v162_v53  ;;  %p1805_p5 = por %p1804_p4, %p1803_p3 }
  0x6c   :  { %1727 = vrsqrt.f32 %v164_v54  ;;  %v1560_v54 = vpack.c.bf16 %v2007_v51, %v2005_v50  ;;  %p1806_p6 = pnand %p1805_p5, %p1799_p2 }
  0x76   :  { %v1728_v56 = vpop.eup %1727 }
  0x77   :  { %v166_v57 = vmul.f32 %v1728_v56, %v163_v55  ;;  %v2016_v55 = vld [vmem:[#allocation5 + $0x70] sm:$0xff]  ;;  %v2018_v56 = vld [vmem:[#allocation5 + $0xa0] sm:$0xff] }
  0x79   :  { %266 = vxpose.xlu0.b32.start.end [1/1] (short) %v166_v57, 128  ;;  %v1891_v58 = vmul.f32 %v166_v57, %v159_v49  ;;  %v2003_v49 = vld [vmem:[#allocation5 + $0x40] sm:$0xff]  ;;  %v2020_v57 = vld [vmem:[#allocation5 + $0xd8] sm:$0xff] }
  0x7a   :  { %v1558_v53 = vpack.c.bf16 %v2003_v49, %v2001_v48  ;;  %v1564_v1 = vpack.c.bf16 %v2022_v61, %v2020_v57 }
  0x7b   :  { %v2010_v52 = vsub.f32 %v167_v46, %v1891_v58  ;;  %v1562_v58 = vpack.c.bf16 %v2018_v56, %v2016_v55  ;;  %v2058_v46 = vld [vmem:[#allocation5 + $0x1f8] sm:$0xff] }
  0xa2   :  { %1725 = vset.pattern.permute.xlu0 %v1832_v0  ;;  %v1920_v0 = vld [vmem:[#allocation5 + $0xf8] sm:$0xff] }
  0xa3   :  { %v1532_v9 = vpack.c.bf16 %v1920_v0, %v1918_v8 }
  0xa5   :  { %1533 = vmatprep.subr.bf16.mxu0 %v1532_v9  ;;  %v2034_v9 = vld [vmem:[#allocation5 + $0x138] sm:$0xff] }
  0xa6   :  { %1535 = vmatpush1.bf16.msra.mxu0 %v1534_v12  ;;  %v2036_v12 = vld [vmem:[#allocation5 + $0x168] sm:$0xff] }
  0xa7   :  { %1537 = vmatprep.subr.bf16.mxu0 %v1536_v15  ;;  %v1566_v15 = vpack.c.bf16 %v2032_v7, %v2030_v4 }
  0xaa   :  { %1539 = vmatpush1.bf16.msra.mxu0 %v1538_v18  ;;  %v1568_v18 = vpack.c.bf16 %v2036_v12, %v2034_v9 }
  0xab   :  { %1541 = vmatprep.subr.bf16.mxu0 %v1540_v21  ;;  %v2042_v21 = vld [vmem:[#allocation5 + $0x130] sm:$0xff] }
  0xae   :  { %1543 = vmatpush1.bf16.msra.mxu0 %v1542_v24  ;;  %v2044_v24 = vld [vmem:[#allocation5 + $0x160] sm:$0xff] }
  0xaf   :  { %1545 = vmatprep.subr.bf16.mxu0 %v1544_v27  ;;  %v2046_v27 = vld [vmem:[#allocation5 + $0x198] sm:$0xff] }
  0xb2   :  { %1547 = vmatpush1.bf16.msra.mxu0 %v1546_v30  ;;  %v2048_v30 = vld [vmem:[#allocation5 + $0x1c8] sm:$0xff] }
  0xb3   :  { %1549 = vmatprep.subr.bf16.mxu0 %v1548_v34  ;;  %v1570_v34 = vpack.c.bf16 %v2044_v24, %v2042_v21 }
  0xb6   :  { %1551 = vmatpush1.bf16.msra.mxu0 %v1550_v39  ;;  %v1572_v39 = vpack.c.bf16 %v2048_v30, %v2046_v27 }
  0xb7   :  { %1553 = vmatprep.subr.bf16.mxu0 %v1552_v40  ;;  %v2054_v40 = vld [vmem:[#allocation5 + $0x190] sm:$0xff] }
  0xba   :  { %1555 = vmatpush1.bf16.msra.mxu0 %v1554_v45  ;;  %v2056_v45 = vld [vmem:[#allocation5 + $0x1c0] sm:$0xff] }
  0xbb   :  { %1557 = vmatprep.subr.bf16.mxu0 %v1556_v47  ;;  %v2060_v47 = vld [vmem:[#allocation5 + $0x228] sm:$0xff] }
  0xbd   :  { %539 = vmatmul.mubr.f32.vlgmr.msra.gmra.mrb[0].mxu0 %v2010_v52 }
  0xbe   :  { %1559 = vmatpush1.bf16.msra.mxu0 %v1558_v53  ;;  %609 = vmatprep.mubr.f32.mxu0 %v2801_v38  ;;  %v1574_v53 = vpack.c.bf16 %v2056_v45, %v2054_v40 }
  0xbf   :  { %1561 = vmatprep.subr.bf16.mxu0 %v1560_v54  ;;  %v1576_v54 = vpack.c.bf16 %v2060_v47, %v2058_v46 }
  0xc2   :  { %1563 = vmatpush1.bf16.msra.mxu0 %v1562_v58  ;;  %v2066_v58 = vld [vmem:[#allocation5 + $0x1f0] sm:$0xff] }
  0xc3   :  { %1565 = vmatprep.subr.bf16.mxu0 %v1564_v1  ;;  %v2068_v1 = vld [vmem:[#allocation5 + $0x220] sm:$0xff] }
  0xc4   :  { %v1578_v38 = vpack.c.bf16 %v2068_v1, %v2066_v58 }
  0xc6   :  { %1567 = vmatpush1.bf16.msra.mxu0 %v1566_v15  ;;  %v2070_v15 = vld [vmem:[#allocation5 + $0x258] sm:$0xff] }
  0xc7   :  { %1569 = vmatprep.subr.bf16.mxu0 %v1568_v18  ;;  %2855 = vst [vmem:[#allocation18_spill] sm:$0xff] %v2070_v15  ;;  %v2072_v18 = vld [vmem:[#allocation5 + $0x288] sm:$0xff] }
  0xc8   :  { %2856 = vst [vmem:[#allocation19_spill] sm:$0xff] %v2072_v18 }
  0xca   :  { %1571 = vmatpush1.bf16.msra.mxu0 %v1570_v34  ;;  %v1580_v34 = vpack.c.bf16 %v2072_v18, %v2070_v15  ;;  %v2094_v18 = vld [vmem:[#allocation5 + $0x28] sm:$0xff] }
  0xcb   :  { %1573 = vmatprep.subr.bf16.mxu0 %v1572_v39  ;;  %v2078_v39 = vld [vmem:[#allocation5 + $0x250] sm:$0xff]  ;;  %2863 = vst [vmem:[#allocation26_spill] sm:$0xff] %v2094_v18 }
  0xcc   :  { %2857 = vst [vmem:[#allocation20_spill] sm:$0xff] %v2078_v39  ;;  %v1582_v36 = vpack.c.bf16 %v2080_v42, %v2078_v39  ;;  %v2104_v42 = vld [vmem:[#allocation5 + $0x50] sm:$0xff] }
  0xcd   :  { %2866 = vst [vmem:[#allocation29_spill] sm:$0xff] %v2104_v42 }
  0xce   :  { %1575 = vmatpush1.bf16.msra.mxu0 %v1574_v53  ;;  %v1584_v53 = vpack.c.bf16 %v2084_v37, %v2082_v41  ;;  %v2106_v37 = vld [vmem:[#allocation5 + $0x88] sm:$0xff]  ;;  %v2108_v41 = vld [vmem:[#allocation5 + $0xb8] sm:$0xff] }
  0xcf   :  { %1577 = vmatprep.subr.bf16.mxu0 %v1576_v54  ;;  %v2090_v54 = vld [vmem:[#allocation5 + $0x2b0] sm:$0xff]  ;;  %2867 = vst [vmem:[#allocation30_spill] sm:$0xff] %v2106_v37  ;;  %2868 = vst [vmem:[#allocation31_spill] sm:$0xff] %v2108_v41 }
  0xd0   :  { %2861 = vst [vmem:[#allocation24_spill] sm:$0xff] %v2090_v54  ;;  %v1586_v33 = vpack.c.bf16 %v2092_v35, %v2090_v54  ;;  %v2116_v54 = vld [vmem:[#allocation5 + $0xb0] sm:$0xff]  ;;  %v2120_v35 = vld [vmem:[#allocation5 + $0x118] sm:$0xff] }
  0xd1   :  { %2870 = vst [vmem:[#allocation33_spill] sm:$0xff] %v2116_v54  ;;  %2872 = vst [vmem:[#allocation35_spill] sm:$0xff] %v2120_v35 }
  0xd2   :  { %1579 = vmatpush1.bf16.msra.mxu0 %v1578_v38  ;;  %v1588_v38 = vpack.c.bf16 %v2096_v32, %v2094_v18  ;;  %v2118_v18 = vld [vmem:[#allocation5 + $0xe8] sm:$0xff]  ;;  %v2873_v32 = vmov 0.0  }
  0xd3   :  { %1581 = vmatprep.subr.bf16.mxu0 %v1580_v34  ;;  %v2102_v34 = vld [vmem:[#allocation5 + $0x20] sm:$0xff]  ;;  %2871 = vst [vmem:[#allocation34_spill] sm:$0xff] %v2118_v18 }
  0xd4   :  { %2865 = vst [vmem:[#allocation28_spill] sm:$0xff] %v2102_v34  ;;  %v1590_v39 = vpack.c.bf16 %v2104_v42, %v2102_v34  ;;  %v2130_v34 = vld [vmem:[#allocation5 + $0x110] sm:$0xff]  ;;  %v2134_v42 = vld [vmem:[#allocation5 + $0x178] sm:$0xff] }
  0xd5   :  { %2875 = vst [vmem:[#allocation37_spill] sm:$0xff] %v2130_v34  ;;  %2877 = vst [vmem:[#allocation39_spill] sm:$0xff] %v2134_v42 }
  0xd6   :  { %1583 = vmatpush1.bf16.msra.mxu0 %v1582_v36  ;;  %v1592_v36 = vpack.c.bf16 %v2108_v41, %v2106_v37  ;;  %v2128_v37 = vld [vmem:[#allocation5 + $0xe0] sm:$0xff]  ;;  %v2132_v41 = vld [vmem:[#allocation5 + $0x148] sm:$0xff] }
  0xd7   :  { %1585 = vmatprep.subr.bf16.mxu0 %v1584_v53  ;;  %v2114_v53 = vld [vmem:[#allocation5 + $0x80] sm:$0xff]  ;;  %2874 = vst [vmem:[#allocation36_spill] sm:$0xff] %v2128_v37  ;;  %2876 = vst [vmem:[#allocation38_spill] sm:$0xff] %v2132_v41 }
  0xd8   :  { %2869 = vst [vmem:[#allocation32_spill] sm:$0xff] %v2114_v53 }
  0xda   :  { %1587 = vmatpush1.bf16.msra.mxu0 %v1586_v33  ;;  %v1594_v33 = vpack.c.bf16 %v2116_v54, %v2114_v53  ;;  %v1600_v53 = vpack.c.bf16 %v2134_v42, %v2132_v41  ;;  %v2142_v54 = vld [vmem:[#allocation5 + $0x170] sm:$0xff]  ;;  %v2156_v41 = vld [vmem:[#allocation5 + $0x208] sm:$0xff]  ;;  %v2158_v42 = vld [vmem:[#allocation5 + $0x238] sm:$0xff] }
  0xdb   :  { %1589 = vmatprep.subr.bf16.mxu0 %v1588_v38  ;;  %v1596_v38 = vpack.c.bf16 %v2120_v35, %v2118_v18  ;;  %v2144_v18 = vld [vmem:[#allocation5 + $0x1a8] sm:$0xff]  ;;  %v2146_v35 = vld [vmem:[#allocation5 + $0x1d8] sm:$0xff]  ;;  %2883 = vst [vmem:[#allocation45_spill] sm:$0xff] %v2156_v41  ;;  %2884 = vst [vmem:[#allocation46_spill] sm:$0xff] %v2158_v42 }
  0xdc   :  { %2879 = vst [vmem:[#allocation41_spill] sm:$0xff] %v2144_v18  ;;  %2880 = vst [vmem:[#allocation42_spill] sm:$0xff] %v2146_v35 }
  0xdd   :  { %610 = vmatmul.mubr.f32.vlgmr.msra.gmra.mrb[2].mxu0 %v2010_v52 }
  0xde   :  { %1591 = vmatpush1.bf16.msra.mxu0 %v1590_v39  ;;  %680 = vmatprep.mubr.f32.mxu0 %v2873_v32  ;;  %v1598_v39 = vpack.c.bf16 %v2130_v34, %v2128_v37  ;;  %v2154_v37 = vld [vmem:[#allocation5 + $0x1d0] sm:$0xff] }
  0xdf   :  { %1593 = vmatprep.subr.bf16.mxu0 %v1592_v36  ;;  %v2140_v36 = vld [vmem:[#allocation5 + $0x140] sm:$0xff]  ;;  %2882 = vst [vmem:[#allocation44_spill] sm:$0xff] %v2154_v37 }
  0xe0   :  { %2878 = vst [vmem:[#allocation40_spill] sm:$0xff] %v2140_v36  ;;  %v1602_v15 = vpack.c.bf16 %v2142_v54, %v2140_v36  ;;  %v2166_v36 = vld [vmem:[#allocation5 + $0x230] sm:$0xff] }
  0xe1   :  { %2886 = vst [vmem:[#allocation48_spill] sm:$0xff] %v2166_v36 }
  0xe2   :  { %1595 = vmatpush1.bf16.msra.mxu0 %v1594_v33  ;;  %v1604_v33 = vpack.c.bf16 %v2146_v35, %v2144_v18  ;;  %v2170_v35 = vld [vmem:[#allocation5 + $0x268] sm:$0xff] }
  0xe3   :  { %1597 = vmatprep.subr.bf16.mxu0 %v1596_v38  ;;  %v2152_v38 = vld [vmem:[#allocation5 + $0x1a0] sm:$0xff]  ;;  %2887 = vst [vmem:[#allocation49_spill] sm:$0xff] %v2170_v35 }
  0xe4   :  { %2881 = vst [vmem:[#allocation43_spill] sm:$0xff] %v2152_v38  ;;  %v1606_v34 = vpack.c.bf16 %v2154_v37, %v2152_v38  ;;  %v2176_v38 = vld [vmem:[#allocation5 + $0x260] sm:$0xff] }
  0xe5   :  { %2889 = vst [vmem:[#allocation51_spill] sm:$0xff] %v2176_v38 }
  0xe6   :  { %1599 = vmatpush1.bf16.msra.mxu0 %v1598_v39  ;;  %v1608_v39 = vpack.c.bf16 %v2158_v42, %v2156_v41  ;;  %v2178_v41 = vld [vmem:[#allocation5 + $0x290] sm:$0xff] }
  0xe7   :  { %1601 = vmatprep.subr.bf16.mxu0 %v1600_v53  ;;  %v2164_v53 = vld [vmem:[#allocation5 + $0x200] sm:$0xff] }
  0xe8   :  { %2885 = vst [vmem:[#allocation47_spill] sm:$0xff] %v2164_v53  ;;  %v1610_v18 = vpack.c.bf16 %v2166_v36, %v2164_v53  ;;  %v2188_v36 = vld [vmem:[#allocation5 + $0x2c0] sm:$0xff] }
  0xe9   :  { %2892 = vst [vmem:[#allocation54_spill] sm:$0xff] %v2188_v36 }
  0xea   :  { %1603 = vmatpush1.bf16.msra.mxu0 %v1602_v15  ;;  %v2172_v15 = vld [vmem:[#allocation5 + $0x298] sm:$0xff] }
  0xeb   :  { %1605 = vmatprep.subr.bf16.mxu0 %v1604_v33  ;;  %2888 = vst [vmem:[#allocation50_spill] sm:$0xff] %v2172_v15  ;;  %v1612_v33 = vpack.c.bf16 %v2172_v15, %v2170_v35  ;;  %v2190_v35 = vld [vmem:[#allocation5 + $0x2f0] sm:$0xff] }
  0xec   :  { %2893 = vst [vmem:[#allocation55_spill] sm:$0xff] %v2190_v35  ;;  %v1618_v37 = vpack.c.bf16 %v2190_v35, %v2188_v36 }
  0xee   :  { %1607 = vmatpush1.bf16.msra.mxu0 %v1606_v34  ;;  %v1614_v34 = vpack.c.bf16 %v2178_v41, %v2176_v38 }
  0xef   :  { %1609 = vmatprep.subr.bf16.mxu0 %v1608_v39  ;;  %v2182_v39 = vld [vmem:[#allocation5 + $0x2c8] sm:$0xff] }
  0xf0   :  { %2890 = vst [vmem:[#allocation52_spill] sm:$0xff] %v2182_v39 }
  0xf2   :  { %1611 = vmatpush1.bf16.msra.mxu0 %v1610_v18  ;;  %v2184_v18 = vld [vmem:[#allocation5 + $0x2f8] sm:$0xff] }
  0xf3   :  { %1613 = vmatprep.subr.bf16.mxu0 %v1612_v33  ;;  %2891 = vst [vmem:[#allocation53_spill] sm:$0xff] %v2184_v18  ;;  %v1616_v53 = vpack.c.bf16 %v2184_v18, %v2182_v39 }
  0xf6   :  { %1615 = vmatpush1.bf16.msra.mxu0 %v1614_v34 }
  0xf7   :  { %1617 = vmatprep.subr.bf16.mxu0 %v1616_v53 }
  0xf9   :  { %v282_v42 = vpop.trf.xlu0 }
  0xfa   :  { %300 = vperm.xlu0 %1725, %v282_v42   ;;  %1619 = vmatpush1.bf16.msra.mxu0 %v1618_v37 }
  0xfd   :  { %v283_v15 = vpop.trf.xlu0  ;;  %681 = vmatmul.mubr.f32.vlgmr.msra.gmra.mrb[4].mxu0 %v2010_v52 }
  0xfe   :  { %305 = vperm.xlu1 %1726, %v283_v15   ;;  %990 = vmatprep.mubr.f32.mxu0 %v2873_v32 }
 0x101   :  { %v284_v42 = vpop.trf.xlu0 }
 0x102   :  { %310 = vperm.xlu1 %1726, %v284_v42  }
 0x105   :  { %v285_v33 = vpop.trf.xlu0 }
 0x106   :  { %315 = vperm.xlu1 %1726, %v285_v33  }
 0x109   :  { %v286_v34 = vpop.trf.xlu0 }
 0x10a   :  { %320 = vperm.xlu1 %1726, %v286_v34  }
 0x10d   :  { %v287_v39 = vpop.trf.xlu0 }
 0x10e   :  { %325 = vperm.xlu1 %1726, %v287_v39  }
 0x111   :  { %v288_v38 = vpop.trf.xlu0 }
 0x112   :  { %330 = vperm.xlu1 %1726, %v288_v38  }
 0x115   :  { %v289_v18 = vpop.trf.xlu0 }
 0x116   :  { %335 = vperm.xlu1 %1726, %v289_v18  }
 0x119   :  { %v290_v36 = vpop.trf.xlu0 }
 0x11a   :  { %340 = vperm.xlu1 %1726, %v290_v36  }
 0x11d   :  { %v291_v53 = vpop.trf.xlu0 }
 0x11e   :  { %345 = vperm.xlu1 %1726, %v291_v53  }
 0x121   :  { %v292_v37 = vpop.trf.xlu0 }
 0x122   :  { %350 = vperm.xlu1 %1726, %v292_v37  }
 0x125   :  { %v293_v15 = vpop.trf.xlu0 }
 0x126   :  { %355 = vperm.xlu1 %1726, %v293_v15  }
 0x129   :  { %v294_v52 = vpop.trf.xlu0 }
 0x12a   :  { %360 = vperm.xlu1 %1726, %v294_v52  }
 0x12d   :  { %v295_v42 = vpop.trf.xlu0 }
 0x12e   :  { %365 = vperm.xlu1 %1726, %v295_v42  }
 0x131   :  { %v296_v33 = vpop.trf.xlu0 }
 0x132   :  { %370 = vperm.xlu1 %1726, %v296_v33  }
 0x135   :  { %v297_v34 = vpop.trf.xlu0 }
 0x136   :  { %375 = vperm.xlu1 %1726, %v297_v34  }
 0x179   :  { %v2196_v39 = vpop.permute.xlu0 %300 }
 0x17a   :  { %v380_v38 = vmul.f32 %v2196_v39, %v2001_v48  ;;  %v379_v18 = vmul.f32 %v2196_v39, %v1893_v59  ;;  %v381_v53 = vmul.f32 %v2196_v39, %v1990_v43  ;;  %v378_v37 = vmul.f32 %v2196_v39, %v1899_v62 }
 0x17d   :  { %v2200_v36 = vpop.permute.xlu1 %305 }
 0x17e   :  { %v385_v15 = vmul.f32 %v2200_v36, %v1895_v60  ;;  %v387_v52 = vmul.f32 %v2200_v36, %v1992_v44  ;;  %v384_v48 = vmul.f32 %v2200_v36, %v1901_v63  ;;  %v386_v42 = vmul.f32 %v2200_v36, %v2003_v49 }
 0x180   :  { %v1620_v33 = vpack.c.bf16 %v385_v15, %v379_v18  ;;  %v1652_v59 = vpack.c.bf16 %v387_v52, %v381_v53  ;;  %v1622_v34 = vpack.c.bf16 %v384_v48, %v378_v37  ;;  %v1654_v35 = vpack.c.bf16 %v386_v42, %v380_v38 }
 0x181   :  { %v2216_v43 = vpop.permute.xlu1 %310 }
 0x182   :  { %1621 = vmatprep.subr.bf16.mxu1 %v1620_v33  ;;  %1653 = vmatprep.subr.bf16.mxu0 %v1652_v59  ;;  %v391_v62 = vmul.f32 %v2216_v43, %v1906_v2  ;;  %v393_v63 = vmul.f32 %v2216_v43, %v2005_v50  ;;  %v390_v44 = vmul.f32 %v2216_v43, %v1912_v5 }
 0x183   :  { %1623 = vmatpush1.bf16.msra.mxu1 %v1622_v34  ;;  %1655 = vmatpush1.bf16.msra.mxu0 %v1654_v35  ;;  %v392_v49 = vmul.f32 %v2216_v43, %v2016_v55 }
 0x185   :  { %v2218_v60 = vpop.permute.xlu1 %315 }
 0x186   :  { %v397_v38 = vmul.f32 %v2218_v60, %v1908_v3  ;;  %v399_v35 = vmul.f32 %v2218_v60, %v2007_v51  ;;  %v396_v18 = vmul.f32 %v2218_v60, %v1914_v6  ;;  %v398_v2 = vmul.f32 %v2218_v60, %v2018_v56 }
 0x188   :  { %v1624_v53 = vpack.c.bf16 %v397_v38, %v391_v62  ;;  %v1656_v50 = vpack.c.bf16 %v399_v35, %v393_v63  ;;  %v1626_v37 = vpack.c.bf16 %v396_v18, %v390_v44  ;;  %v1658_v15 = vpack.c.bf16 %v398_v2, %v392_v49 }
 0x189   :  { %v2236_v5 = vpop.permute.xlu1 %320 }
 0x18a   :  { %1625 = vmatprep.subr.bf16.mxu1 %v1624_v53  ;;  %1657 = vmatprep.subr.bf16.mxu0 %v1656_v50  ;;  %v403_v51 = vmul.f32 %v2236_v5, %v1918_v8  ;;  %v405_v6 = vmul.f32 %v2236_v5, %v2020_v57  ;;  %v402_v55 = vmul.f32 %v2236_v5, %v1924_v10 }
 0x18b   :  { %1627 = vmatpush1.bf16.msra.mxu1 %v1626_v37  ;;  %1659 = vmatpush1.bf16.msra.mxu0 %v1658_v15  ;;  %v404_v56 = vmul.f32 %v2236_v5, %v2030_v4 }
 0x18d   :  { %v2238_v3 = vpop.permute.xlu1 %325 }
 0x18e   :  { %v409_v52 = vmul.f32 %v2238_v3, %v1920_v0  ;;  %v411_v48 = vmul.f32 %v2238_v3, %v2022_v61  ;;  %v408_v42 = vmul.f32 %v2238_v3, %v1926_v11  ;;  %v410_v8 = vmul.f32 %v2238_v3, %v2032_v7 }
 0x190   :  { %v1628_v33 = vpack.c.bf16 %v409_v52, %v403_v51  ;;  %v1660_v57 = vpack.c.bf16 %v411_v48, %v405_v6  ;;  %v1630_v59 = vpack.c.bf16 %v408_v42, %v402_v55  ;;  %v1662_v34 = vpack.c.bf16 %v410_v8, %v404_v56  ;;  %v2895_v42 = vld [vmem:[#allocation12_spill] sm:$0xff] }
 0x191   :  { %v2256_v10 = vpop.permute.xlu1 %330  ;;  %v2896_v8 = vld [vmem:[#allocation20_spill] sm:$0xff] }
 0x192   :  { %1629 = vmatprep.subr.bf16.mxu1 %v1628_v33  ;;  %1661 = vmatprep.subr.bf16.mxu0 %v1660_v57  ;;  %v415_v61 = vmul.f32 %v2256_v10, %v1930_v13  ;;  %v417_v11 = vmul.f32 %v2256_v10, %v2034_v9  ;;  %v414_v4 = vmul.f32 %v2256_v10, %v1936_v16  ;;  %v2897_v57 = vld [vmem:[#allocation11_spill] sm:$0xff] }
 0x193   :  { %1631 = vmatpush1.bf16.msra.mxu1 %v1630_v59  ;;  %1663 = vmatpush1.bf16.msra.mxu0 %v1662_v34  ;;  %v416_v7 = vmul.f32 %v2256_v10, %v2042_v21  ;;  %v2898_v34 = vld [vmem:[#allocation19_spill] sm:$0xff] }
 0x195   :  { %v2258_v0 = vpop.permute.xlu1 %335 }
 0x196   :  { %v421_v62 = vmul.f32 %v2258_v0, %v1932_v14  ;;  %v423_v63 = vmul.f32 %v2258_v0, %v2036_v12  ;;  %v420_v44 = vmul.f32 %v2258_v0, %v1938_v17  ;;  %v422_v13 = vmul.f32 %v2258_v0, %v2044_v24 }
 0x198   :  { %v1632_v49 = vpack.c.bf16 %v421_v62, %v415_v61  ;;  %v1664_v9 = vpack.c.bf16 %v423_v63, %v417_v11  ;;  %v1634_v38 = vpack.c.bf16 %v420_v44, %v414_v4  ;;  %v1666_v35 = vpack.c.bf16 %v422_v13, %v416_v7  ;;  %v2899_v11 = vld [vmem:[#allocation13_spill] sm:$0xff] }
 0x199   :  { %v2276_v16 = vpop.permute.xlu1 %340  ;;  %v2900_v7 = vld [vmem:[#allocation21_spill] sm:$0xff] }
 0x19a   :  { %1633 = vmatprep.subr.bf16.mxu1 %v1632_v49  ;;  %1665 = vmatprep.subr.bf16.mxu0 %v1664_v9  ;;  %v427_v12 = vmul.f32 %v2276_v16, %v1942_v19  ;;  %v429_v17 = vmul.f32 %v2276_v16, %v2046_v27  ;;  %v426_v21 = vmul.f32 %v2276_v16, %v1948_v22 }
 0x19b   :  { %1635 = vmatpush1.bf16.msra.mxu1 %v1634_v38  ;;  %1667 = vmatpush1.bf16.msra.mxu0 %v1666_v35  ;;  %v428_v24 = vmul.f32 %v2276_v16, %v2054_v40  ;;  %v2901_v38 = vld [vmem:[#allocation14_spill] sm:$0xff] }
 0x19d   :  { %v2278_v14 = vpop.permute.xlu1 %345 }
 0x19e   :  { %v433_v18 = vmul.f32 %v2278_v14, %v1944_v20  ;;  %v435_v2 = vmul.f32 %v2278_v14, %v2048_v30  ;;  %v432_v53 = vmul.f32 %v2278_v14, %v1950_v23  ;;  %v434_v19 = vmul.f32 %v2278_v14, %v2056_v45 }
 0x1a0   :  { %v1636_v50 = vpack.c.bf16 %v433_v18, %v427_v12  ;;  %v1668_v27 = vpack.c.bf16 %v435_v2, %v429_v17  ;;  %v1638_v37 = vpack.c.bf16 %v432_v53, %v426_v21  ;;  %v1670_v15 = vpack.c.bf16 %v434_v19, %v428_v24  ;;  %v2902_v12 = vld [vmem:[#allocation22_spill] sm:$0xff]  ;;  %v2903_v21 = vld [vmem:[#allocation27_spill] sm:$0xff]  ;;  %v2904_v18 = vld [vmem:[#allocation25_spill] sm:$0xff] }
 0x1a1   :  { %v2296_v22 = vpop.permute.xlu1 %350  ;;  %v389_v24 = vmul.f32 %v2200_v36, %v2903_v21  ;;  %v2905_v53 = vld [vmem:[#allocation15_spill] sm:$0xff] }
 0x1a2   :  { %1637 = vmatprep.subr.bf16.mxu1 %v1636_v50  ;;  %1669 = vmatprep.subr.bf16.mxu0 %v1668_v27  ;;  %v439_v30 = vmul.f32 %v2296_v22, %v1954_v25  ;;  %v441_v23 = vmul.f32 %v2296_v22, %v2058_v46  ;;  %v438_v40 = vmul.f32 %v2296_v22, %v1960_v28  ;;  %v2906_v50 = vld [vmem:[#allocation23_spill] sm:$0xff] }
 0x1a3   :  { %1639 = vmatpush1.bf16.msra.mxu1 %v1638_v37  ;;  %1671 = vmatpush1.bf16.msra.mxu0 %v1670_v15  ;;  %v440_v45 = vmul.f32 %v2296_v22, %v2066_v58  ;;  %v2894_v58 = vld [vmem:[#allocation18_spill] sm:$0xff]  ;;  %v2907_v37 = vld [vmem:[#allocation24_spill] sm:$0xff] }
 0x1a5   :  { %v2298_v20 = vpop.permute.xlu1 %355 }
 0x1a6   :  { %v445_v51 = vmul.f32 %v2298_v20, %v1956_v26  ;;  %v447_v6 = vmul.f32 %v2298_v20, %v2060_v47  ;;  %v444_v55 = vmul.f32 %v2298_v20, %v1962_v29  ;;  %v446_v25 = vmul.f32 %v2298_v20, %v2068_v1 }
 0x1a8   :  { %v1640_v56 = vpack.c.bf16 %v445_v51, %v439_v30  ;;  %v1672_v46 = vpack.c.bf16 %v447_v6, %v441_v23  ;;  %v1642_v52 = vpack.c.bf16 %v444_v55, %v438_v40  ;;  %v1674_v48 = vpack.c.bf16 %v446_v25, %v440_v45  ;;  %v2908_v30 = vld [vmem:[#allocation16_spill] sm:$0xff]  ;;  %v2909_v40 = vld [vmem:[#allocation17_spill] sm:$0xff]  ;;  %v2910_v25 = vld [vmem:[#allocation26_spill] sm:$0xff] }
 0x1a9   :  { %v2316_v28 = vpop.permute.xlu1 %360 }
 0x1aa   :  { %1641 = vmatprep.subr.bf16.mxu1 %v1640_v56  ;;  %1673 = vmatprep.subr.bf16.mxu0 %v1672_v46  ;;  %v451_v47 = vmul.f32 %v2316_v28, %v1966_v31  ;;  %v453_v29 = vmul.f32 %v2316_v28, %v2894_v58  ;;  %v450_v1 = vmul.f32 %v2316_v28, %v2895_v42  ;;  %v2912_v58 = vld [vmem:[#allocation31_spill] sm:$0xff]  ;;  %v2913_v42 = vld [vmem:[#allocation28_spill] sm:$0xff] }
 0x1ab   :  { %1643 = vmatpush1.bf16.msra.mxu1 %v1642_v52  ;;  %1675 = vmatpush1.bf16.msra.mxu0 %v1674_v48  ;;  %v452_v33 = vmul.f32 %v2316_v28, %v2896_v8  ;;  %v383_v56 = vmul.f32 %v2196_v39, %v2910_v25  ;;  %v2911_v52 = vld [vmem:[#allocation29_spill] sm:$0xff]  ;;  %v2914_v8 = vld [vmem:[#allocation30_spill] sm:$0xff] }
 0x1ac   :  { %v388_v48 = vmul.f32 %v2200_v36, %v2911_v52  ;;  %v2370_v36 = vld [vmem:[#allocation2] sm:$0xff] }
 0x1ad   :  { %v2318_v26 = vpop.permute.xlu1 %365  ;;  %v2426_v52 = vld [vmem:[#allocation2 + $0x20] sm:$0xff] }
 0x1ae   :  { %v457_v59 = vmul.f32 %v2318_v26, %v2897_v57  ;;  %v459_v61 = vmul.f32 %v2318_v26, %v2898_v34  ;;  %v456_v4 = vmul.f32 %v2318_v26, %v2899_v11  ;;  %v458_v31 = vmul.f32 %v2318_v26, %v2900_v7  ;;  %v2916_v11 = vld [vmem:[#allocation35_spill] sm:$0xff] }
 0x1b0   :  { %v1644_v62 = vpack.c.bf16 %v457_v59, %v451_v47  ;;  %v1676_v63 = vpack.c.bf16 %v459_v61, %v453_v29  ;;  %v1646_v44 = vpack.c.bf16 %v456_v4, %v450_v1  ;;  %v1678_v13 = vpack.c.bf16 %v458_v31, %v452_v33  ;;  %v2915_v59 = vld [vmem:[#allocation33_spill] sm:$0xff]  ;;  %v2917_v4 = vld [vmem:[#allocation32_spill] sm:$0xff] }
 0x1b1   :  { %v2336_v49 = vpop.permute.xlu1 %370  ;;  %v1684_v47 = vpack.c.bf16 %v389_v24, %v383_v56  ;;  %v401_v29 = vmul.f32 %v2218_v60, %v2912_v58  ;;  %v382_v1 = vmul.f32 %v2196_v39, %v2913_v42  ;;  %v395_v33 = vmul.f32 %v2216_v43, %v2914_v8  ;;  %v2930_v56 = vld [vmem:[#allocation48_spill] sm:$0xff]  ;;  %v2932_v58 = vld [vmem:[#allocation47_spill] sm:$0xff] }
 0x1b2   :  { %1645 = vmatprep.subr.bf16.mxu1 %v1644_v62  ;;  %1677 = vmatprep.subr.bf16.mxu0 %v1676_v63  ;;  %v463_v35 = vmul.f32 %v2336_v49, %v2901_v38  ;;  %v465_v17 = vmul.f32 %v2336_v49, %v2902_v12  ;;  %v464_v15 = vmul.f32 %v2336_v49, %v2907_v37  ;;  %v2919_v63 = vld [vmem:[#allocation37_spill] sm:$0xff]  ;;  %v2921_v12 = vld [vmem:[#allocation36_spill] sm:$0xff] }
 0x1b3   :  { %1647 = vmatpush1.bf16.msra.mxu1 %v1646_v44  ;;  %1679 = vmatpush1.bf16.msra.mxu0 %v1678_v13  ;;  %v462_v23 = vmul.f32 %v2336_v49, %v2908_v30  ;;  %v1686_v57 = vpack.c.bf16 %v388_v48, %v382_v1  ;;  %v400_v34 = vmul.f32 %v2218_v60, %v2915_v59  ;;  %v2918_v60 = vld [vmem:[#allocation34_spill] sm:$0xff]  ;;  %v2384_v13 = vld [vmem:[#allocation2 + $0x8] sm:$0xff] }
 0x1b4   :  { %v1688_v61 = vpack.c.bf16 %v401_v29, %v395_v33  ;;  %v413_v39 = vmul.f32 %v2238_v3, %v2916_v11  ;;  %v394_v7 = vmul.f32 %v2216_v43, %v2917_v4  ;;  %v407_v31 = vmul.f32 %v2236_v5, %v2918_v60  ;;  %v2440_v33 = vld [vmem:[#allocation2 + $0x28] sm:$0xff]  ;;  %v2937_v11 = vld [vmem:[#allocation55_spill] sm:$0xff] }
 0x1b5   :  { %v2338_v9 = vpop.permute.xlu1 %375  ;;  %v412_v44 = vmul.f32 %v2238_v3, %v2919_v63  ;;  %v2922_v3 = vld [vmem:[#allocation38_spill] sm:$0xff]  ;;  %v442_v29 = vmul.f32 %v2296_v22, %v2932_v58  ;;  %v460_v8 = vmul.f32 %v2318_v26, %v2178_v41  ;;  %v2934_v59 = vld [vmem:[#allocation53_spill] sm:$0xff]  ;;  %v2936_v41 = vld [vmem:[#allocation52_spill] sm:$0xff] }
 0x1b6   :  { %v470_v2 = vmul.f32 %v2338_v9, %v2904_v18  ;;  %v469_v19 = vmul.f32 %v2338_v9, %v2905_v53  ;;  %v471_v27 = vmul.f32 %v2338_v9, %v2906_v50  ;;  %v468_v45 = vmul.f32 %v2338_v9, %v2909_v40  ;;  %v2924_v50 = vld [vmem:[#allocation40_spill] sm:$0xff]  ;;  %v2462_v63 = vld [vmem:[#allocation2 + $0x38] sm:$0xff] }
 0x1b7   :  { %v1690_v62 = vpack.c.bf16 %v400_v34, %v394_v7  ;;  %v1692_v38 = vpack.c.bf16 %v413_v39, %v407_v31  ;;  %v419_v21 = vmul.f32 %v2256_v10, %v2922_v3  ;;  %v424_v18 = vmul.f32 %v2258_v0, %v2142_v54  ;;  %v2925_v54 = vld [vmem:[#allocation41_spill] sm:$0xff]  ;;  %v2935_v34 = vld [vmem:[#allocation51_spill] sm:$0xff]  ;;  %v2454_v7 = vld [vmem:[#allocation2 + $0x30] sm:$0xff] }
 0x1b8   :  { %v1648_v51 = vpack.c.bf16 %v469_v19, %v463_v35  ;;  %v1680_v6 = vpack.c.bf16 %v471_v27, %v465_v17  ;;  %v1682_v55 = vpack.c.bf16 %v470_v2, %v464_v15  ;;  %v1650_v46 = vpack.c.bf16 %v468_v45, %v462_v23  ;;  %v2920_v35 = vld [vmem:[#allocation39_spill] sm:$0xff]  ;;  %v2398_v2 = vld [vmem:[#allocation2 + $0x10] sm:$0xff]  ;;  %v2926_v15 = vld [vmem:[#allocation44_spill] sm:$0xff] }
 0x1b9   :  { %v425_v43 = vmul.f32 %v2258_v0, %v2920_v35  ;;  %v406_v17 = vmul.f32 %v2236_v5, %v2921_v12  ;;  %v2923_v19 = vld [vmem:[#allocation42_spill] sm:$0xff]  ;;  %v418_v27 = vmul.f32 %v2256_v10, %v2924_v50  ;;  %v431_v0 = vmul.f32 %v2276_v16, %v2925_v54  ;;  %v2412_v23 = vld [vmem:[#allocation2 + $0x18] sm:$0xff]  ;;  %v2492_v35 = vld [vmem:[#allocation2 + $0x60] sm:$0xff] }
 0x1ba   :  { %1649 = vmatprep.subr.bf16.mxu1 %v1648_v51  ;;  %1681 = vmatprep.subr.bf16.mxu0 %v1680_v6  ;;  %v437_v5 = vmul.f32 %v2278_v14, %v2923_v19  ;;  %v436_v30 = vmul.f32 %v2278_v14, %v2926_v15  ;;  %v2927_v45 = vld [vmem:[#allocation46_spill] sm:$0xff]  ;;  %v2928_v51 = vld [vmem:[#allocation43_spill] sm:$0xff]  ;;  %v2929_v14 = vld [vmem:[#allocation45_spill] sm:$0xff]  ;;  %v472_v39 = vmul.f32 %v2338_v9, %v2937_v11 }
 0x1bb   :  { %1651 = vmatpush1.bf16.msra.mxu1 %v1650_v46  ;;  %1683 = vmatpush1.bf16.msra.mxu0 %v1682_v55  ;;  %v1694_v24 = vpack.c.bf16 %v412_v44, %v406_v17  ;;  %v1696_v53 = vpack.c.bf16 %v425_v43, %v419_v21  ;;  %v1698_v37 = vpack.c.bf16 %v424_v18, %v418_v27  ;;  %v2480_v44 = vld [vmem:[#allocation2 + $0x50] sm:$0xff]  ;;  %v2498_v43 = vld [vmem:[#allocation2 + $0x68] sm:$0xff]  ;;  %v2510_v17 = vld [vmem:[#allocation2 + $0x78] sm:$0xff] }
 0x1bc   :  { %1685 = vmatprep.subr.bf16.mxu1 %v1684_v47  ;;  %v1700_v40 = vpack.c.bf16 %v437_v5, %v431_v0  ;;  %v449_v10 = vmul.f32 %v2298_v20, %v2927_v45  ;;  %v430_v6 = vmul.f32 %v2276_v16, %v2928_v51  ;;  %v443_v55 = vmul.f32 %v2296_v22, %v2929_v14  ;;  %v2931_v47 = vld [vmem:[#allocation50_spill] sm:$0xff]  ;;  %v2516_v3 = vld [vmem:[#allocation2 + $0x80] sm:$0xff]  ;;  %v2522_v21 = vld [vmem:[#allocation2 + $0x88] sm:$0xff] }
 0x1bd   :  { %v448_v46 = vmul.f32 %v2298_v20, %v2930_v56  ;;  %v461_v16 = vmul.f32 %v2318_v26, %v2931_v47  ;;  %v2933_v20 = vld [vmem:[#allocation49_spill] sm:$0xff]  ;;  %v473_v22 = vmul.f32 %v2338_v9, %v2934_v59  ;;  %v467_v26 = vmul.f32 %v2336_v49, %v2936_v41  ;;  %v2468_v9 = vld [vmem:[#allocation2 + $0x40] sm:$0xff]  ;;  %v2504_v12 = vld [vmem:[#allocation2 + $0x70] sm:$0xff] }
 0x1be   :  { %776 = vmatmul.mubr.f32.vlgmr.msra.gmra.mrb[0].mxu1 %v2370_v36  ;;  %991 = vmatmul.mubr.f32.vlgmr.msra.gmra.mrb[6].mxu0 %v2370_v36  ;;  %v1702_v25 = vpack.c.bf16 %v436_v30, %v430_v6  ;;  %v1704_v48 = vpack.c.bf16 %v449_v10, %v443_v55  ;;  %v455_v42 = vmul.f32 %v2316_v28, %v2933_v20  ;;  %v2538_v19 = vld [vmem:[#allocation2 + $0x98] sm:$0xff]  ;;  %v2544_v5 = vld [vmem:[#allocation2 + $0xa0] sm:$0xff]  ;;  %v2550_v50 = vld [vmem:[#allocation2 + $0xa8] sm:$0xff]  ;;  %v687_v0 = vlaneseq }
 0x1bf   :  { %1687 = vmatpush1.bf16.msra.mxu1 %v1686_v57  ;;  %781 = vmatprep.mubr.f32.mxu1 %v2873_v32  ;;  %v1706_v1 = vpack.c.bf16 %v448_v46, %v442_v29  ;;  %v1712_v60 = vpack.c.bf16 %v473_v22, %v467_v26  ;;  %v2556_v27 = vld [vmem:[#allocation2 + $0xb0] sm:$0xff]  ;;  %v2562_v54 = vld [vmem:[#allocation2 + $0xb8] sm:$0xff] }
 0x1c0   :  { %1689 = vmatprep.subr.bf16.mxu1 %v1688_v61  ;;  %996 = vmatprep.mubr.f32.mxu0 %v2873_v32  ;;  %v1708_v57 = vpack.c.bf16 %v461_v16, %v455_v42  ;;  %v454_v61 = vmul.f32 %v2316_v28, %v2935_v34  ;;  %v2938_v28 = vld [vmem:[#allocation54_spill] sm:$0xff]  ;;  %v688_v15 = vshrl.u32 %v687_v0, 7 }
 0x1c1   :  { %v466_v31 = vmul.f32 %v2336_v49, %v2938_v28  ;;  %v2474_v49 = vld [vmem:[#allocation2 + $0x48] sm:$0xff] }
 0x1c2   :  { %782 = vmatmul.mubr.f32.gmra.mrb[2].mxu1 %v2384_v13  ;;  %997 = vmatmul.mubr.f32.gmra.mrb[8].mxu0 %v2384_v13  ;;  %v1710_v4 = vpack.c.bf16 %v460_v8, %v454_v61 }
 0x1c3   :  { %1691 = vmatpush1.bf16.msra.mxu1 %v1690_v62  ;;  %787 = vmatprep.mubr.f32.mxu1 %v2873_v32  ;;  %v1714_v62 = vpack.c.bf16 %v472_v39, %v466_v31 }
 0x1c4   :  { %1693 = vmatprep.subr.bf16.mxu1 %v1692_v38  ;;  %1002 = vmatprep.mubr.f32.mxu0 %v2873_v32  ;;  %v2486_v38 = vld [vmem:[#allocation2 + $0x58] sm:$0xff] }
 0x1c6   :  { %788 = vmatmul.mubr.f32.gmra.mrb[4].mxu1 %v2398_v2  ;;  %1003 = vmatmul.mubr.f32.gmra.mrb[10].mxu0 %v2398_v2 }
 0x1c7   :  { %1695 = vmatpush1.bf16.msra.mxu1 %v1694_v24  ;;  %793 = vmatprep.mubr.f32.mxu1 %v2873_v32  ;;  %v2526_v24 = vpop.f32.mrb[0].mxu0 }
 0x1c8   :  { %1697 = vmatprep.subr.bf16.mxu1 %v1696_v53  ;;  %1008 = vmatprep.mubr.f32.mxu0 %v2873_v32  ;;  %v2530_v18 = vpop.f32.mrb[1].mxu0  ;;  %v2532_v53 = vld [vmem:[#allocation2 + $0x90] sm:$0xff] }
 0x1c9   :  { %v611_v30 = vpop.f32.mrb[2].mxu0 }
 0x1ca   :  { %794 = vmatmul.mubr.f32.gmra.mrb[6].mxu1 %v2412_v23  ;;  %1009 = vmatmul.mubr.f32.gmra.mrb[12].mxu0 %v2412_v23  ;;  %v613_v45 = vpop.f32.mrb[3].mxu0 }
 0x1cb   :  { %1699 = vmatpush1.bf16.msra.mxu1 %v1698_v37  ;;  %799 = vmatprep.mubr.f32.mxu1 %v2873_v32  ;;  %v1753_v37 = vld [vmem:[#allocation2 + $0xc0] sm:$0xf] }
 0x1cc   :  { %1701 = vmatprep.subr.bf16.mxu1 %v1700_v40  ;;  %1014 = vmatprep.mubr.f32.mxu0 %v2873_v32  ;;  %v689_v40 = vsub.s32 0, %v688_v15 }
 0x1ce   :  { %800 = vmatmul.mubr.f32.gmra.mrb[8].mxu1 %v2426_v52  ;;  %1015 = vmatmul.mubr.f32.gmra.mrb[14].mxu0 %v2426_v52 }
 0x1cf   :  { %1703 = vmatpush1.bf16.msra.mxu1 %v1702_v25  ;;  %805 = vmatprep.mubr.f32.mxu1 %v2873_v32 }
 0x1d0   :  { %1705 = vmatprep.subr.bf16.mxu1 %v1704_v48  ;;  %1020 = vmatprep.mubr.f32.mxu0 %v2873_v32  ;;  %v682_v10 = vpop.f32.mrb[4].mxu0 }
 0x1d1   :  { %v2571_v51 = vrot.slane %v682_v10, %v689_v40  ;;  %v684_v6 = vpop.f32.mrb[5].mxu0 }
 0x1d2   :  { %806 = vmatmul.mubr.f32.gmra.mrb[10].mxu1 %v2440_v33  ;;  %1021 = vmatmul.mubr.f32.gmra.mrb[16].mxu0 %v2440_v33  ;;  %v2574_v14 = vrot.slane %v684_v6, %v689_v40 }
 0x1d3   :  { %1707 = vmatpush1.bf16.msra.mxu1 %v1706_v1  ;;  %811 = vmatprep.mubr.f32.mxu1 %v2873_v32 }
 0x1d4   :  { %1709 = vmatprep.subr.bf16.mxu1 %v1708_v57  ;;  %1026 = vmatprep.mubr.f32.mxu0 %v2873_v32 }
 0x1d6   :  { %812 = vmatmul.mubr.f32.gmra.mrb[12].mxu1 %v2454_v7  ;;  %1027 = vmatmul.mubr.f32.gmra.mrb[18].mxu0 %v2454_v7 }
 0x1d7   :  { %1711 = vmatpush1.bf16.msra.mxu1 %v1710_v4  ;;  %817 = vmatprep.mubr.f32.mxu1 %v2873_v32 }
 0x1d8   :  { %1713 = vmatprep.subr.bf16.mxu1 %v1712_v60  ;;  %1032 = vmatprep.mubr.f32.mxu0 %v2873_v32 }
 0x1da   :  { %818 = vmatmul.mubr.f32.gmra.mrb[14].mxu1 %v2462_v63  ;;  %1033 = vmatmul.mubr.f32.gmra.mrb[20].mxu0 %v2462_v63 }
 0x1db   :  { %1715 = vmatpush1.bf16.msra.mxu1 %v1714_v62  ;;  %823 = vmatprep.mubr.f32.mxu1 %v2873_v32 }
 0x1dc   :  { %1038 = vmatprep.mubr.f32.mxu0 %v2873_v32 }
 0x1de   :  { %824 = vmatmul.mubr.f32.gmra.mrb[16].mxu1 %v2468_v9  ;;  %1039 = vmatmul.mubr.f32.gmra.mrb[22].mxu0 %v2468_v9 }
 0x1df   :  { %829 = vmatprep.mubr.f32.mxu1 %v2873_v32  ;;  %1044 = vmatprep.mubr.f32.mxu0 %v2873_v32 }
 0x1e2   :  { %830 = vmatmul.mubr.f32.gmra.mrb[18].mxu1 %v2474_v49  ;;  %1045 = vmatmul.mubr.f32.gmra.mrb[24].mxu0 %v2474_v49 }
 0x1e3   :  { %835 = vmatprep.mubr.f32.mxu1 %v2873_v32  ;;  %1050 = vmatprep.mubr.f32.mxu0 %v2873_v32 }
 0x1e6   :  { %836 = vmatmul.mubr.f32.gmra.mrb[20].mxu1 %v2480_v44  ;;  %1051 = vmatmul.mubr.f32.gmra.mrb[26].mxu0 %v2480_v44 }
 0x1e7   :  { %841 = vmatprep.mubr.f32.mxu1 %v2873_v32  ;;  %1056 = vmatprep.mubr.f32.mxu0 %v2873_v32 }
 0x1ea   :  { %842 = vmatmul.mubr.f32.gmra.mrb[22].mxu1 %v2486_v38  ;;  %1057 = vmatmul.mubr.f32.gmra.mrb[28].mxu0 %v2486_v38 }
 0x1eb   :  { %847 = vmatprep.mubr.f32.mxu1 %v2873_v32  ;;  %1062 = vmatprep.mubr.f32.mxu0 %v2873_v32 }
 0x1ee   :  { %848 = vmatmul.mubr.f32.gmra.mrb[24].mxu1 %v2492_v35  ;;  %1063 = vmatmul.mubr.f32.gmra.mrb[30].mxu0 %v2492_v35 }
 0x1ef   :  { %853 = vmatprep.mubr.f32.mxu1 %v2873_v32  ;;  %1068 = vmatprep.mubr.f32.mxu0 %v2873_v32 }
 0x1f2   :  { %854 = vmatmul.mubr.f32.gmra.mrb[26].mxu1 %v2498_v43  ;;  %1069 = vmatmul.mubr.f32.gmra.mrb[32].mxu0 %v2498_v43 }
 0x1f3   :  { %859 = vmatprep.mubr.f32.mxu1 %v2873_v32  ;;  %1074 = vmatprep.mubr.f32.mxu0 %v2873_v32 }
 0x1f6   :  { %860 = vmatmul.mubr.f32.gmra.mrb[28].mxu1 %v2504_v12  ;;  %1075 = vmatmul.mubr.f32.gmra.mrb[34].mxu0 %v2504_v12 }
 0x1f7   :  { %865 = vmatprep.mubr.f32.mxu1 %v2873_v32  ;;  %1080 = vmatprep.mubr.f32.mxu0 %v2873_v32 }
 0x1fa   :  { %866 = vmatmul.mubr.f32.gmra.mrb[30].mxu1 %v2510_v17  ;;  %1081 = vmatmul.mubr.f32.gmra.mrb[36].mxu0 %v2510_v17 }
 0x1fb   :  { %871 = vmatprep.mubr.f32.mxu1 %v2873_v32  ;;  %1086 = vmatprep.mubr.f32.mxu0 %v2873_v32 }
 0x1fe   :  { %872 = vmatmul.mubr.f32.gmra.mrb[32].mxu1 %v2516_v3  ;;  %1087 = vmatmul.mubr.f32.gmra.mrb[38].mxu0 %v2516_v3 }
 0x1ff   :  { %877 = vmatprep.mubr.f32.mxu1 %v2873_v32  ;;  %1092 = vmatprep.mubr.f32.mxu0 %v2873_v32 }
 0x202   :  { %878 = vmatmul.mubr.f32.gmra.mrb[34].mxu1 %v2522_v21  ;;  %1093 = vmatmul.mubr.f32.gmra.mrb[40].mxu0 %v2522_v21 }
 0x203   :  { %883 = vmatprep.mubr.f32.mxu1 %v2873_v32  ;;  %1098 = vmatprep.mubr.f32.mxu0 %v2873_v32 }
 0x206   :  { %884 = vmatmul.mubr.f32.gmra.mrb[36].mxu1 %v2532_v53  ;;  %1099 = vmatmul.mubr.f32.gmra.mrb[42].mxu0 %v2532_v53 }
 0x207   :  { %889 = vmatprep.mubr.f32.mxu1 %v2873_v32  ;;  %1104 = vmatprep.mubr.f32.mxu0 %v2873_v32 }
 0x20a   :  { %890 = vmatmul.mubr.f32.gmra.mrb[38].mxu1 %v2538_v19  ;;  %1105 = vmatmul.mubr.f32.gmra.mrb[44].mxu0 %v2538_v19 }
 0x20b   :  { %895 = vmatprep.mubr.f32.mxu1 %v2873_v32  ;;  %1110 = vmatprep.mubr.f32.mxu0 %v2873_v32 }
 0x20e   :  { %896 = vmatmul.mubr.f32.gmra.mrb[40].mxu1 %v2544_v5  ;;  %1111 = vmatmul.mubr.f32.gmra.mrb[46].mxu0 %v2544_v5 }
 0x20f   :  { %901 = vmatprep.mubr.f32.mxu1 %v2873_v32  ;;  %1116 = vmatprep.mubr.f32.mxu0 %v2873_v32 }
 0x212   :  { %902 = vmatmul.mubr.f32.gmra.mrb[42].mxu1 %v2550_v50  ;;  %1117 = vmatmul.mubr.f32.gmra.mrb[48].mxu0 %v2550_v50 }
 0x213   :  { %907 = vmatprep.mubr.f32.mxu1 %v2873_v32  ;;  %1122 = vmatprep.mubr.f32.mxu0 %v2873_v32 }
 0x216   :  { %908 = vmatmul.mubr.f32.gmra.mrb[44].mxu1 %v2556_v27  ;;  %1123 = vmatmul.mubr.f32.gmra.mrb[50].mxu0 %v2556_v27 }
 0x217   :  { %913 = vmatprep.mubr.f32.mxu1 %v2873_v32  ;;  %1128 = vmatprep.mubr.f32.mxu0 %v2873_v32 }
 0x21a   :  { %914 = vmatmul.mubr.f32.gmra.mrb[46].mxu1 %v2562_v54  ;;  %1129 = vmatmul.mubr.f32.gmra.mrb[52].mxu0 %v2562_v54 }
 0x21b   :  { %919 = vmatprep.mubr.f32.mxu1 %v2873_v32  ;;  %1134 = vmatprep.mubr.f32.mxu0 %v2873_v32 }
 0x21e   :  { %920 = vmatmul.mubr.f32.gmra.mrb[48].mxu1 %v1753_v37  ;;  %1135 = vmatmul.mubr.f32.gmra.mrb[54].mxu0 %v1753_v37 }
 0x21f   :  { %1205 = vmatprep.mubr.f32.mxu1 %v2873_v32 }
 0x222   :  { %1206 = vmatmul.mubr.f32.vlgmr.msra.gmra.mrb[50].mxu1 %v2370_v36  ;;  %v2622_v36 = vrot.slane %v2526_v24, %v689_v40 }
 0x223   :  { %1211 = vmatprep.mubr.f32.mxu1 %v2873_v32 }
 0x226   :  { %1212 = vmatmul.mubr.f32.gmra.mrb[52].mxu1 %v2384_v13  ;;  %v2624_v13 = vrot.slane %v611_v30, %v689_v40 }
 0x227   :  { %1217 = vmatprep.mubr.f32.mxu1 %v2873_v32 }
 0x22a   :  { %1218 = vmatmul.mubr.f32.gmra.mrb[54].mxu1 %v2398_v2  ;;  %v2627_v2 = vrot.slane %v2530_v18, %v689_v40 }
 0x22b   :  { %1223 = vmatprep.mubr.f32.mxu1 %v2873_v32 }
 0x22e   :  { %1224 = vmatmul.mubr.f32.gmra.mrb[56].mxu1 %v2412_v23  ;;  %v2629_v23 = vrot.slane %v613_v45, %v689_v40 }
 0x22f   :  { %1229 = vmatprep.mubr.f32.mxu1 %v2873_v32 }
 0x232   :  { %1230 = vmatmul.mubr.f32.gmra.mrb[58].mxu1 %v2426_v52 }
 0x233   :  { %1235 = vmatprep.mubr.f32.mxu1 %v2873_v32 }
 0x236   :  { %1236 = vmatmul.mubr.f32.gmra.mrb[60].mxu1 %v2440_v33 }
 0x237   :  { %1241 = vmatprep.mubr.f32.mxu1 %v2873_v32 }
 0x23a   :  { %1242 = vmatmul.mubr.f32.gmra.mrb[62].mxu1 %v2454_v7 }
 0x23b   :  { %1247 = vmatprep.mubr.f32.mxu1 %v2873_v32 }
 0x23e   :  { %1248 = vmatmul.mubr.f32.gmra.mrb[64].mxu1 %v2462_v63 }
 0x23f   :  { %1253 = vmatprep.mubr.f32.mxu1 %v2873_v32 }
 0x242   :  { %1254 = vmatmul.mubr.f32.gmra.mrb[66].mxu1 %v2468_v9 }
 0x243   :  { %1259 = vmatprep.mubr.f32.mxu1 %v2873_v32 }
 0x246   :  { %1260 = vmatmul.mubr.f32.gmra.mrb[68].mxu1 %v2474_v49 }
 0x247   :  { %1265 = vmatprep.mubr.f32.mxu1 %v2873_v32 }
 0x24a   :  { %1266 = vmatmul.mubr.f32.gmra.mrb[70].mxu1 %v2480_v44 }
 0x24b   :  { %1271 = vmatprep.mubr.f32.mxu1 %v2873_v32 }
 0x24e   :  { %1272 = vmatmul.mubr.f32.gmra.mrb[72].mxu1 %v2486_v38 }
 0x24f   :  { %1277 = vmatprep.mubr.f32.mxu1 %v2873_v32 }
 0x252   :  { %1278 = vmatmul.mubr.f32.gmra.mrb[74].mxu1 %v2492_v35 }
 0x253   :  { %1283 = vmatprep.mubr.f32.mxu1 %v2873_v32 }
 0x256   :  { %1284 = vmatmul.mubr.f32.gmra.mrb[76].mxu1 %v2498_v43 }
 0x257   :  { %1289 = vmatprep.mubr.f32.mxu1 %v2873_v32 }
 0x25a   :  { %1290 = vmatmul.mubr.f32.gmra.mrb[78].mxu1 %v2504_v12 }
 0x25b   :  { %1295 = vmatprep.mubr.f32.mxu1 %v2873_v32 }
 0x25e   :  { %1296 = vmatmul.mubr.f32.gmra.mrb[80].mxu1 %v2510_v17 }
 0x25f   :  { %1301 = vmatprep.mubr.f32.mxu1 %v2873_v32 }
 0x262   :  { %1302 = vmatmul.mubr.f32.gmra.mrb[82].mxu1 %v2516_v3 }
 0x263   :  { %1307 = vmatprep.mubr.f32.mxu1 %v2873_v32 }
 0x266   :  { %1308 = vmatmul.mubr.f32.gmra.mrb[84].mxu1 %v2522_v21 }
 0x267   :  { %1313 = vmatprep.mubr.f32.mxu1 %v2873_v32 }
 0x26a   :  { %1314 = vmatmul.mubr.f32.gmra.mrb[86].mxu1 %v2532_v53 }
 0x26b   :  { %1319 = vmatprep.mubr.f32.mxu1 %v2873_v32 }
 0x26e   :  { %1320 = vmatmul.mubr.f32.gmra.mrb[88].mxu1 %v2538_v19 }
 0x26f   :  { %1325 = vmatprep.mubr.f32.mxu1 %v2873_v32 }
 0x272   :  { %1326 = vmatmul.mubr.f32.gmra.mrb[90].mxu1 %v2544_v5 }
 0x273   :  { %1331 = vmatprep.mubr.f32.mxu1 %v2873_v32 }
 0x276   :  { %1332 = vmatmul.mubr.f32.gmra.mrb[92].mxu1 %v2550_v50 }
 0x277   :  { %1337 = vmatprep.mubr.f32.mxu1 %v2873_v32 }
 0x27a   :  { %1338 = vmatmul.mubr.f32.gmra.mrb[94].mxu1 %v2556_v27 }
 0x27b   :  { %1343 = vmatprep.mubr.f32.mxu1 %v2873_v32 }
 0x27e   :  { %1344 = vmatmul.mubr.f32.gmra.mrb[96].mxu1 %v2562_v54 }
 0x27f   :  { %1349 = vmatprep.mubr.f32.mxu1 %v2873_v32 }
 0x282   :  { %1350 = vmatmul.mubr.f32.gmra.mrb[98].mxu1 %v1753_v37 }
 0x291   :  { %v777_v55 = vpop.f32.mrb[0].mxu1  ;;  %v992_v25 = vpop.f32.mrb[6].mxu0 }
 0x292   :  { %v778_v56 = vadd.f32 %v777_v55, %v2622_v36  ;;  %v779_v46 = vpop.f32.mrb[1].mxu1  ;;  %v993_v52 = vadd.f32 %v992_v25, %v2624_v13  ;;  %v994_v48 = vpop.f32.mrb[7].mxu0 }
 0x293   :  { %v780_v32 = vadd.f32 %v779_v46, %v2627_v2  ;;  %v995_v47 = vadd.f32 %v994_v48, %v2629_v23 }
 0x294   :  { %1356 = vst [vmem:[#allocation7] sm:$0xff] %v778_v56  ;;  %1358 = vst [vmem:[#allocation7 + $0x10] sm:$0xff] %v993_v52 }
 0x295   :  { %1357 = vst [vmem:[#allocation7 + $0x8] sm:$0xff] %v780_v32  ;;  %v783_v16 = vpop.f32.mrb[2].mxu1  ;;  %1359 = vst [vmem:[#allocation7 + $0x18] sm:$0xff] %v995_v47  ;;  %v998_v58 = vpop.f32.mrb[8].mxu0 }
 0x296   :  { %v784_v29 = vadd.f32 %v783_v16, %v2622_v36  ;;  %v785_v20 = vpop.f32.mrb[3].mxu1  ;;  %v999_v42 = vadd.f32 %v998_v58, %v2624_v13  ;;  %v1000_v1 = vpop.f32.mrb[9].mxu0 }
 0x297   :  { %v786_v8 = vadd.f32 %v785_v20, %v2627_v2  ;;  %v1001_v33 = vadd.f32 %v1000_v1, %v2629_v23 }
 0x298   :  { %1362 = vst [vmem:[#allocation7 + $0x30] sm:$0xff] %v784_v29  ;;  %1364 = vst [vmem:[#allocation7 + $0x40] sm:$0xff] %v999_v42 }
 0x299   :  { %1363 = vst [vmem:[#allocation7 + $0x38] sm:$0xff] %v786_v8  ;;  %v789_v57 = vpop.f32.mrb[4].mxu1  ;;  %1365 = vst [vmem:[#allocation7 + $0x48] sm:$0xff] %v1001_v33  ;;  %v1004_v59 = vpop.f32.mrb[10].mxu0 }
 0x29a   :  { %v790_v22 = vadd.f32 %v789_v57, %v2622_v36  ;;  %v791_v34 = vpop.f32.mrb[5].mxu1  ;;  %v1005_v61 = vadd.f32 %v1004_v59, %v2624_v13  ;;  %v1006_v41 = vpop.f32.mrb[11].mxu0 }
 0x29b   :  { %v792_v26 = vadd.f32 %v791_v34, %v2627_v2  ;;  %v1007_v11 = vadd.f32 %v1006_v41, %v2629_v23 }
 0x29c   :  { %1368 = vst [vmem:[#allocation7 + $0x60] sm:$0xff] %v790_v22  ;;  %1370 = vst [vmem:[#allocation7 + $0x70] sm:$0xff] %v1005_v61 }
 0x29d   :  { %1369 = vst [vmem:[#allocation7 + $0x68] sm:$0xff] %v792_v26  ;;  %v795_v39 = vpop.f32.mrb[6].mxu1  ;;  %1371 = vst [vmem:[#allocation7 + $0x78] sm:$0xff] %v1007_v11  ;;  %v1010_v4 = vpop.f32.mrb[12].mxu0 }
 0x29e   :  { %v796_v7 = vadd.f32 %v795_v39, %v2622_v36  ;;  %v797_v60 = vpop.f32.mrb[7].mxu1  ;;  %v1011_v28 = vadd.f32 %v1010_v4, %v2624_v13  ;;  %v1012_v31 = vpop.f32.mrb[13].mxu0 }
 0x29f   :  { %v798_v62 = vadd.f32 %v797_v60, %v2627_v2  ;;  %v1013_v63 = vadd.f32 %v1012_v31, %v2629_v23 }
 0x2a0   :  { %1374 = vst [vmem:[#allocation7 + $0x90] sm:$0xff] %v796_v7  ;;  %1376 = vst [vmem:[#allocation7 + $0xa0] sm:$0xff] %v1011_v28 }
 0x2a1   :  { %1375 = vst [vmem:[#allocation7 + $0x98] sm:$0xff] %v798_v62  ;;  %v801_v9 = vpop.f32.mrb[8].mxu1  ;;  %1377 = vst [vmem:[#allocation7 + $0xa8] sm:$0xff] %v1013_v63  ;;  %v1016_v49 = vpop.f32.mrb[14].mxu0 }
 0x2a2   :  { %v802_v44 = vadd.f32 %v801_v9, %v2622_v36  ;;  %v803_v38 = vpop.f32.mrb[9].mxu1  ;;  %v1017_v35 = vadd.f32 %v1016_v49, %v2624_v13  ;;  %v1018_v43 = vpop.f32.mrb[15].mxu0 }
 0x2a3   :  { %v804_v12 = vadd.f32 %v803_v38, %v2627_v2  ;;  %v1019_v17 = vadd.f32 %v1018_v43, %v2629_v23 }
 0x2a4   :  { %1380 = vst [vmem:[#allocation7 + $0xc0] sm:$0xff] %v802_v44  ;;  %1382 = vst [vmem:[#allocation7 + $0xd0] sm:$0xff] %v1017_v35 }
 0x2a5   :  { %1381 = vst [vmem:[#allocation7 + $0xc8] sm:$0xff] %v804_v12  ;;  %v807_v3 = vpop.f32.mrb[10].mxu1  ;;  %1383 = vst [vmem:[#allocation7 + $0xd8] sm:$0xff] %v1019_v17  ;;  %v1022_v21 = vpop.f32.mrb[16].mxu0 }
 0x2a6   :  { %v808_v24 = vadd.f32 %v807_v3, %v2622_v36  ;;  %v809_v18 = vpop.f32.mrb[11].mxu1  ;;  %v1023_v53 = vadd.f32 %v1022_v21, %v2624_v13  ;;  %v1024_v19 = vpop.f32.mrb[17].mxu0 }
 0x2a7   :  { %v810_v5 = vadd.f32 %v809_v18, %v2627_v2  ;;  %v1025_v50 = vadd.f32 %v1024_v19, %v2629_v23 }
 0x2a8   :  { %1386 = vst [vmem:[#allocation7 + $0xf0] sm:$0xff] %v808_v24  ;;  %1388 = vst [vmem:[#allocation7 + $0x100] sm:$0xff] %v1023_v53 }
 0x2a9   :  { %1387 = vst [vmem:[#allocation7 + $0xf8] sm:$0xff] %v810_v5  ;;  %v813_v27 = vpop.f32.mrb[12].mxu1  ;;  %1389 = vst [vmem:[#allocation7 + $0x108] sm:$0xff] %v1025_v50  ;;  %v1028_v54 = vpop.f32.mrb[18].mxu0 }
 0x2aa   :  { %v814_v0 = vadd.f32 %v813_v27, %v2622_v36  ;;  %v815_v37 = vpop.f32.mrb[13].mxu1  ;;  %v1029_v15 = vadd.f32 %v1028_v54, %v2624_v13  ;;  %v1030_v30 = vpop.f32.mrb[19].mxu0 }
 0x2ab   :  { %v816_v40 = vadd.f32 %v815_v37, %v2627_v2  ;;  %v1031_v45 = vadd.f32 %v1030_v30, %v2629_v23 }
 0x2ac   :  { %1392 = vst [vmem:[#allocation7 + $0x120] sm:$0xff] %v814_v0  ;;  %1394 = vst [vmem:[#allocation7 + $0x130] sm:$0xff] %v1029_v15 }
 0x2ad   :  { %1393 = vst [vmem:[#allocation7 + $0x128] sm:$0xff] %v816_v40  ;;  %v819_v10 = vpop.f32.mrb[14].mxu1  ;;  %1395 = vst [vmem:[#allocation7 + $0x138] sm:$0xff] %v1031_v45  ;;  %v1034_v6 = vpop.f32.mrb[20].mxu0 }
 0x2ae   :  { %v820_v55 = vadd.f32 %v819_v10, %v2622_v36  ;;  %v821_v25 = vpop.f32.mrb[15].mxu1  ;;  %v1035_v56 = vadd.f32 %v1034_v6, %v2624_v13  ;;  %v1036_v46 = vpop.f32.mrb[21].mxu0 }
 0x2af   :  { %v822_v52 = vadd.f32 %v821_v25, %v2627_v2  ;;  %v1037_v48 = vadd.f32 %v1036_v46, %v2629_v23 }
 0x2b0   :  { %1398 = vst [vmem:[#allocation7 + $0x150] sm:$0xff] %v820_v55  ;;  %1400 = vst [vmem:[#allocation7 + $0x160] sm:$0xff] %v1035_v56 }
 0x2b1   :  { %1399 = vst [vmem:[#allocation7 + $0x158] sm:$0xff] %v822_v52  ;;  %v825_v32 = vpop.f32.mrb[16].mxu1  ;;  %1401 = vst [vmem:[#allocation7 + $0x168] sm:$0xff] %v1037_v48  ;;  %v1040_v47 = vpop.f32.mrb[22].mxu0 }
 0x2b2   :  { %v826_v16 = vadd.f32 %v825_v32, %v2622_v36  ;;  %v827_v58 = vpop.f32.mrb[17].mxu1  ;;  %v1041_v29 = vadd.f32 %v1040_v47, %v2624_v13  ;;  %v1042_v20 = vpop.f32.mrb[23].mxu0 }
 0x2b3   :  { %v828_v42 = vadd.f32 %v827_v58, %v2627_v2  ;;  %v1043_v1 = vadd.f32 %v1042_v20, %v2629_v23 }
 0x2b4   :  { %1404 = vst [vmem:[#allocation7 + $0x180] sm:$0xff] %v826_v16  ;;  %1406 = vst [vmem:[#allocation7 + $0x190] sm:$0xff] %v1041_v29 }
 0x2b5   :  { %1405 = vst [vmem:[#allocation7 + $0x188] sm:$0xff] %v828_v42  ;;  %v831_v8 = vpop.f32.mrb[18].mxu1  ;;  %1407 = vst [vmem:[#allocation7 + $0x198] sm:$0xff] %v1043_v1  ;;  %v1046_v33 = vpop.f32.mrb[24].mxu0 }
 0x2b6   :  { %v832_v57 = vadd.f32 %v831_v8, %v2622_v36  ;;  %v833_v59 = vpop.f32.mrb[19].mxu1  ;;  %v1047_v22 = vadd.f32 %v1046_v33, %v2624_v13  ;;  %v1048_v34 = vpop.f32.mrb[25].mxu0 }
 0x2b7   :  { %v834_v61 = vadd.f32 %v833_v59, %v2627_v2  ;;  %v1049_v41 = vadd.f32 %v1048_v34, %v2629_v23 }
 0x2b8   :  { %1410 = vst [vmem:[#allocation7 + $0x1b0] sm:$0xff] %v832_v57  ;;  %1412 = vst [vmem:[#allocation7 + $0x1c0] sm:$0xff] %v1047_v22 }
 0x2b9   :  { %1411 = vst [vmem:[#allocation7 + $0x1b8] sm:$0xff] %v834_v61  ;;  %1413 = vst [vmem:[#allocation7 + $0x1c8] sm:$0xff] %v1049_v41  ;;  %v837_v26 = vpop.f32.mrb[20].mxu1  ;;  %v1052_v11 = vpop.f32.mrb[26].mxu0 }
 0x2ba   :  { %v838_v39 = vadd.f32 %v837_v26, %v2622_v36  ;;  %v1053_v4 = vadd.f32 %v1052_v11, %v2624_v13  ;;  %v839_v7 = vpop.f32.mrb[21].mxu1  ;;  %v1054_v60 = vpop.f32.mrb[27].mxu0 }
 0x2bb   :  { %v840_v28 = vadd.f32 %v839_v7, %v2627_v2  ;;  %v1055_v31 = vadd.f32 %v1054_v60, %v2629_v23 }
 0x2bc   :  { %1416 = vst [vmem:[#allocation7 + $0x1e0] sm:$0xff] %v838_v39  ;;  %1418 = vst [vmem:[#allocation7 + $0x1f0] sm:$0xff] %v1053_v4 }
 0x2bd   :  { %1417 = vst [vmem:[#allocation7 + $0x1e8] sm:$0xff] %v840_v28  ;;  %1419 = vst [vmem:[#allocation7 + $0x1f8] sm:$0xff] %v1055_v31  ;;  %v843_v62 = vpop.f32.mrb[22].mxu1  ;;  %v1058_v63 = vpop.f32.mrb[28].mxu0 }
 0x2be   :  { %v844_v9 = vadd.f32 %v843_v62, %v2622_v36  ;;  %v1059_v49 = vadd.f32 %v1058_v63, %v2624_v13  ;;  %v845_v44 = vpop.f32.mrb[23].mxu1  ;;  %v1060_v38 = vpop.f32.mrb[29].mxu0 }
 0x2bf   :  { %v846_v35 = vadd.f32 %v845_v44, %v2627_v2  ;;  %v1061_v43 = vadd.f32 %v1060_v38, %v2629_v23 }
 0x2c0   :  { %1422 = vst [vmem:[#allocation7 + $0x210] sm:$0xff] %v844_v9  ;;  %1424 = vst [vmem:[#allocation7 + $0x220] sm:$0xff] %v1059_v49 }
 0x2c1   :  { %1423 = vst [vmem:[#allocation7 + $0x218] sm:$0xff] %v846_v35  ;;  %1425 = vst [vmem:[#allocation7 + $0x228] sm:$0xff] %v1061_v43  ;;  %v849_v12 = vpop.f32.mrb[24].mxu1  ;;  %v1064_v17 = vpop.f32.mrb[30].mxu0 }
 0x2c2   :  { %v850_v3 = vadd.f32 %v849_v12, %v2622_v36  ;;  %v1065_v21 = vadd.f32 %v1064_v17, %v2624_v13  ;;  %v851_v24 = vpop.f32.mrb[25].mxu1  ;;  %v1066_v18 = vpop.f32.mrb[31].mxu0 }
 0x2c3   :  { %v852_v53 = vadd.f32 %v851_v24, %v2627_v2  ;;  %v1067_v19 = vadd.f32 %v1066_v18, %v2629_v23 }
 0x2c4   :  { %1428 = vst [vmem:[#allocation7 + $0x240] sm:$0xff] %v850_v3  ;;  %1430 = vst [vmem:[#allocation7 + $0x250] sm:$0xff] %v1065_v21 }
 0x2c5   :  { %1429 = vst [vmem:[#allocation7 + $0x248] sm:$0xff] %v852_v53  ;;  %1431 = vst [vmem:[#allocation7 + $0x258] sm:$0xff] %v1067_v19  ;;  %v855_v5 = vpop.f32.mrb[26].mxu1  ;;  %v1070_v50 = vpop.f32.mrb[32].mxu0 }
 0x2c6   :  { %v856_v27 = vadd.f32 %v855_v5, %v2622_v36  ;;  %v1071_v54 = vadd.f32 %v1070_v50, %v2624_v13  ;;  %v857_v0 = vpop.f32.mrb[27].mxu1  ;;  %v1072_v37 = vpop.f32.mrb[33].mxu0 }
 0x2c7   :  { %v858_v15 = vadd.f32 %v857_v0, %v2627_v2  ;;  %v1073_v30 = vadd.f32 %v1072_v37, %v2629_v23 }
 0x2c8   :  { %1434 = vst [vmem:[#allocation7 + $0x270] sm:$0xff] %v856_v27  ;;  %1436 = vst [vmem:[#allocation7 + $0x280] sm:$0xff] %v1071_v54 }
 0x2c9   :  { %1435 = vst [vmem:[#allocation7 + $0x278] sm:$0xff] %v858_v15  ;;  %1437 = vst [vmem:[#allocation7 + $0x288] sm:$0xff] %v1073_v30  ;;  %v861_v40 = vpop.f32.mrb[28].mxu1  ;;  %v1076_v45 = vpop.f32.mrb[34].mxu0 }
 0x2ca   :  { %v862_v10 = vadd.f32 %v861_v40, %v2622_v36  ;;  %v1077_v6 = vadd.f32 %v1076_v45, %v2624_v13  ;;  %v863_v55 = vpop.f32.mrb[29].mxu1  ;;  %v1078_v25 = vpop.f32.mrb[35].mxu0 }
 0x2cb   :  { %v864_v56 = vadd.f32 %v863_v55, %v2627_v2  ;;  %v1079_v46 = vadd.f32 %v1078_v25, %v2629_v23 }
 0x2cc   :  { %1440 = vst [vmem:[#allocation7 + $0x2a0] sm:$0xff] %v862_v10  ;;  %1442 = vst [vmem:[#allocation7 + $0x2b0] sm:$0xff] %v1077_v6 }
 0x2cd   :  { %1441 = vst [vmem:[#allocation7 + $0x2a8] sm:$0xff] %v864_v56  ;;  %1443 = vst [vmem:[#allocation7 + $0x2b8] sm:$0xff] %v1079_v46  ;;  %v867_v52 = vpop.f32.mrb[30].mxu1  ;;  %v1082_v48 = vpop.f32.mrb[36].mxu0 }
 0x2ce   :  { %v868_v32 = vadd.f32 %v867_v52, %v2622_v36  ;;  %v1083_v47 = vadd.f32 %v1082_v48, %v2624_v13  ;;  %v869_v16 = vpop.f32.mrb[31].mxu1  ;;  %v1084_v58 = vpop.f32.mrb[37].mxu0 }
 0x2cf   :  { %v870_v29 = vadd.f32 %v869_v16, %v2627_v2  ;;  %v1085_v20 = vadd.f32 %v1084_v58, %v2629_v23 }
 0x2d0   :  { %1446 = vst [vmem:[#allocation7 + $0x2d0] sm:$0xff] %v868_v32  ;;  %1448 = vst [vmem:[#allocation7 + $0x2e0] sm:$0xff] %v1083_v47 }
 0x2d1   :  { %1447 = vst [vmem:[#allocation7 + $0x2d8] sm:$0xff] %v870_v29  ;;  %1449 = vst [vmem:[#allocation7 + $0x2e8] sm:$0xff] %v1085_v20  ;;  %v873_v42 = vpop.f32.mrb[32].mxu1  ;;  %v1088_v1 = vpop.f32.mrb[38].mxu0 }
 0x2d2   :  { %v874_v8 = vadd.f32 %v873_v42, %v2622_v36  ;;  %v1089_v33 = vadd.f32 %v1088_v1, %v2624_v13  ;;  %v875_v57 = vpop.f32.mrb[33].mxu1  ;;  %v1090_v59 = vpop.f32.mrb[39].mxu0 }
 0x2d3   :  { %v876_v22 = vadd.f32 %v875_v57, %v2627_v2  ;;  %v1091_v34 = vadd.f32 %v1090_v59, %v2629_v23 }
 0x2d4   :  { %1452 = vst [vmem:[#allocation7 + $0x300] sm:$0xff] %v874_v8  ;;  %1454 = vst [vmem:[#allocation7 + $0x310] sm:$0xff] %v1089_v33 }
 0x2d5   :  { %1453 = vst [vmem:[#allocation7 + $0x308] sm:$0xff] %v876_v22  ;;  %1455 = vst [vmem:[#allocation7 + $0x318] sm:$0xff] %v1091_v34  ;;  %v879_v61 = vpop.f32.mrb[34].mxu1  ;;  %v1094_v41 = vpop.f32.mrb[40].mxu0 }
 0x2d6   :  { %v880_v26 = vadd.f32 %v879_v61, %v2622_v36  ;;  %v1095_v11 = vadd.f32 %v1094_v41, %v2624_v13  ;;  %v881_v39 = vpop.f32.mrb[35].mxu1  ;;  %v1096_v4 = vpop.f32.mrb[41].mxu0 }
 0x2d7   :  { %v882_v7 = vadd.f32 %v881_v39, %v2627_v2  ;;  %v1097_v60 = vadd.f32 %v1096_v4, %v2629_v23 }
 0x2d8   :  { %1458 = vst [vmem:[#allocation7 + $0x330] sm:$0xff] %v880_v26  ;;  %1460 = vst [vmem:[#allocation7 + $0x340] sm:$0xff] %v1095_v11 }
 0x2d9   :  { %1459 = vst [vmem:[#allocation7 + $0x338] sm:$0xff] %v882_v7  ;;  %1461 = vst [vmem:[#allocation7 + $0x348] sm:$0xff] %v1097_v60  ;;  %v885_v28 = vpop.f32.mrb[36].mxu1  ;;  %v1100_v31 = vpop.f32.mrb[42].mxu0 }
 0x2da   :  { %v886_v62 = vadd.f32 %v885_v28, %v2622_v36  ;;  %v1101_v63 = vadd.f32 %v1100_v31, %v2624_v13  ;;  %v887_v9 = vpop.f32.mrb[37].mxu1  ;;  %v1102_v49 = vpop.f32.mrb[43].mxu0 }
 0x2db   :  { %v888_v44 = vadd.f32 %v887_v9, %v2627_v2  ;;  %v1103_v38 = vadd.f32 %v1102_v49, %v2629_v23 }
 0x2dc   :  { %1464 = vst [vmem:[#allocation7 + $0x360] sm:$0xff] %v886_v62  ;;  %1466 = vst [vmem:[#allocation7 + $0x370] sm:$0xff] %v1101_v63 }
 0x2dd   :  { %1465 = vst [vmem:[#allocation7 + $0x368] sm:$0xff] %v888_v44  ;;  %1467 = vst [vmem:[#allocation7 + $0x378] sm:$0xff] %v1103_v38  ;;  %v891_v35 = vpop.f32.mrb[38].mxu1  ;;  %v1106_v43 = vpop.f32.mrb[44].mxu0 }
 0x2de   :  { %v892_v12 = vadd.f32 %v891_v35, %v2622_v36  ;;  %v1107_v17 = vadd.f32 %v1106_v43, %v2624_v13  ;;  %v893_v3 = vpop.f32.mrb[39].mxu1  ;;  %v1108_v21 = vpop.f32.mrb[45].mxu0 }
 0x2df   :  { %v894_v24 = vadd.f32 %v893_v3, %v2627_v2  ;;  %v1109_v18 = vadd.f32 %v1108_v21, %v2629_v23 }
 0x2e0   :  { %1470 = vst [vmem:[#allocation7 + $0x390] sm:$0xff] %v892_v12  ;;  %1472 = vst [vmem:[#allocation7 + $0x3a0] sm:$0xff] %v1107_v17 }
 0x2e1   :  { %1471 = vst [vmem:[#allocation7 + $0x398] sm:$0xff] %v894_v24  ;;  %1473 = vst [vmem:[#allocation7 + $0x3a8] sm:$0xff] %v1109_v18  ;;  %v897_v53 = vpop.f32.mrb[40].mxu1  ;;  %v1112_v19 = vpop.f32.mrb[46].mxu0 }
 0x2e2   :  { %v898_v5 = vadd.f32 %v897_v53, %v2622_v36  ;;  %v1113_v50 = vadd.f32 %v1112_v19, %v2624_v13  ;;  %v899_v27 = vpop.f32.mrb[41].mxu1  ;;  %v1114_v54 = vpop.f32.mrb[47].mxu0 }
 0x2e3   :  { %v900_v0 = vadd.f32 %v899_v27, %v2627_v2  ;;  %v1115_v37 = vadd.f32 %v1114_v54, %v2629_v23 }
 0x2e4   :  { %1476 = vst [vmem:[#allocation7 + $0x3c0] sm:$0xff] %v898_v5  ;;  %1478 = vst [vmem:[#allocation7 + $0x3d0] sm:$0xff] %v1113_v50 }
 0x2e5   :  { %1477 = vst [vmem:[#allocation7 + $0x3c8] sm:$0xff] %v900_v0  ;;  %1479 = vst [vmem:[#allocation7 + $0x3d8] sm:$0xff] %v1115_v37  ;;  %v903_v15 = vpop.f32.mrb[42].mxu1  ;;  %v1118_v30 = vpop.f32.mrb[48].mxu0 }
 0x2e6   :  { %v904_v40 = vadd.f32 %v903_v15, %v2622_v36  ;;  %v1119_v45 = vadd.f32 %v1118_v30, %v2624_v13  ;;  %v905_v10 = vpop.f32.mrb[43].mxu1  ;;  %v1120_v6 = vpop.f32.mrb[49].mxu0 }
 0x2e7   :  { %v906_v55 = vadd.f32 %v905_v10, %v2627_v2  ;;  %v1121_v25 = vadd.f32 %v1120_v6, %v2629_v23 }
 0x2e8   :  { %1482 = vst [vmem:[#allocation7 + $0x3f0] sm:$0xff] %v904_v40  ;;  %1484 = vst [vmem:[#allocation7 + $0x400] sm:$0xff] %v1119_v45 }
 0x2e9   :  { %1483 = vst [vmem:[#allocation7 + $0x3f8] sm:$0xff] %v906_v55  ;;  %1485 = vst [vmem:[#allocation7 + $0x408] sm:$0xff] %v1121_v25  ;;  %v909_v56 = vpop.f32.mrb[44].mxu1  ;;  %v1124_v46 = vpop.f32.mrb[50].mxu0 }
 0x2ea   :  { %v910_v52 = vadd.f32 %v909_v56, %v2622_v36  ;;  %v1125_v48 = vadd.f32 %v1124_v46, %v2624_v13  ;;  %v911_v32 = vpop.f32.mrb[45].mxu1  ;;  %v1126_v47 = vpop.f32.mrb[51].mxu0 }
 0x2eb   :  { %v912_v16 = vadd.f32 %v911_v32, %v2627_v2  ;;  %v1127_v58 = vadd.f32 %v1126_v47, %v2629_v23 }
 0x2ec   :  { %1488 = vst [vmem:[#allocation7 + $0x420] sm:$0xff] %v910_v52  ;;  %1490 = vst [vmem:[#allocation7 + $0x430] sm:$0xff] %v1125_v48 }
 0x2ed   :  { %1489 = vst [vmem:[#allocation7 + $0x428] sm:$0xff] %v912_v16  ;;  %1491 = vst [vmem:[#allocation7 + $0x438] sm:$0xff] %v1127_v58  ;;  %v915_v29 = vpop.f32.mrb[46].mxu1  ;;  %v1130_v20 = vpop.f32.mrb[52].mxu0 }
 0x2ee   :  { %v916_v42 = vadd.f32 %v915_v29, %v2622_v36  ;;  %v1131_v1 = vadd.f32 %v1130_v20, %v2624_v13  ;;  %v917_v8 = vpop.f32.mrb[47].mxu1  ;;  %v1132_v33 = vpop.f32.mrb[53].mxu0 }
 0x2ef   :  { %v918_v57 = vadd.f32 %v917_v8, %v2627_v2  ;;  %v1133_v59 = vadd.f32 %v1132_v33, %v2629_v23 }
 0x2f0   :  { %1494 = vst [vmem:[#allocation7 + $0x450] sm:$0xff] %v916_v42  ;;  %1496 = vst [vmem:[#allocation7 + $0x460] sm:$0xff] %v1131_v1 }
 0x2f1   :  { %1495 = vst [vmem:[#allocation7 + $0x458] sm:$0xff] %v918_v57  ;;  %1497 = vst [vmem:[#allocation7 + $0x468] sm:$0xff] %v1133_v59  ;;  %v921_v22 = vpop.f32.mrb[48].mxu1  ;;  %v1136_v34 = vpop.f32.mrb[54].mxu0 }
 0x2f2   :  { %v922_v61 = vadd.f32 %v921_v22, %v2622_v36  ;;  %v1137_v41 = vadd.f32 %v1136_v34, %v2624_v13  ;;  %v923_v26 = vpop.f32.mrb[49].mxu1  ;;  %v1138_v11 = vpop.f32.mrb[55].mxu0 }
 0x2f3   :  { %v924_v39 = vadd.f32 %v923_v26, %v2627_v2  ;;  %v1139_v4 = vadd.f32 %v1138_v11, %v2629_v23 }
 0x2f4   :  { %1500 = vst [vmem:[#allocation7 + $0x480] sm:$0xf] %v922_v61  ;;  %1502 = vst [vmem:[#allocation7 + $0x490] sm:$0xf] %v1137_v41 }
 0x2f5   :  { %1501 = vst [vmem:[#allocation7 + $0x488] sm:$0xf] %v924_v39  ;;  %1503 = vst [vmem:[#allocation7 + $0x498] sm:$0xf] %v1139_v4  ;;  %v1207_v7 = vpop.f32.mrb[50].mxu1 }
 0x2f6   :  { %v1208_v60 = vadd.f32 %v1207_v7, %v2571_v51  ;;  %v1209_v28 = vpop.f32.mrb[51].mxu1 }
 0x2f7   :  { %v1210_v31 = vadd.f32 %v1209_v28, %v2574_v14 }
 0x2f8   :  { %1360 = vst [vmem:[#allocation7 + $0x20] sm:$0xff] %v1208_v60 }
 0x2f9   :  { %1361 = vst [vmem:[#allocation7 + $0x28] sm:$0xff] %v1210_v31  ;;  %v1213_v36 = vpop.f32.mrb[52].mxu1 }
 0x2fa   :  { %v1214_v13 = vadd.f32 %v1213_v36, %v2571_v51  ;;  %v1215_v62 = vpop.f32.mrb[53].mxu1 }
 0x2fb   :  { %v1216_v2 = vadd.f32 %v1215_v62, %v2574_v14 }
 0x2fc   :  { %1366 = vst [vmem:[#allocation7 + $0x50] sm:$0xff] %v1214_v13 }
 0x2fd   :  { %1367 = vst [vmem:[#allocation7 + $0x58] sm:$0xff] %v1216_v2  ;;  %v1219_v23 = vpop.f32.mrb[54].mxu1 }
 0x2fe   :  { %v1220_v63 = vadd.f32 %v1219_v23, %v2571_v51  ;;  %v1221_v9 = vpop.f32.mrb[55].mxu1 }
 0x2ff   :  { %v1222_v49 = vadd.f32 %v1221_v9, %v2574_v14 }
 0x300   :  { %1372 = vst [vmem:[#allocation7 + $0x80] sm:$0xff] %v1220_v63 }
 0x301   :  { %1373 = vst [vmem:[#allocation7 + $0x88] sm:$0xff] %v1222_v49  ;;  %v1225_v44 = vpop.f32.mrb[56].mxu1 }
 0x302   :  { %v1226_v38 = vadd.f32 %v1225_v44, %v2571_v51  ;;  %v1227_v35 = vpop.f32.mrb[57].mxu1 }
 0x303   :  { %v1228_v43 = vadd.f32 %v1227_v35, %v2574_v14 }
 0x304   :  { %1378 = vst [vmem:[#allocation7 + $0xb0] sm:$0xff] %v1226_v38 }
 0x305   :  { %1379 = vst [vmem:[#allocation7 + $0xb8] sm:$0xff] %v1228_v43  ;;  %v1231_v12 = vpop.f32.mrb[58].mxu1 }
 0x306   :  { %v1232_v17 = vadd.f32 %v1231_v12, %v2571_v51  ;;  %v1233_v3 = vpop.f32.mrb[59].mxu1 }
 0x307   :  { %v1234_v21 = vadd.f32 %v1233_v3, %v2574_v14 }
 0x308   :  { %1384 = vst [vmem:[#allocation7 + $0xe0] sm:$0xff] %v1232_v17 }
 0x309   :  { %1385 = vst [vmem:[#allocation7 + $0xe8] sm:$0xff] %v1234_v21  ;;  %v1237_v24 = vpop.f32.mrb[60].mxu1 }
 0x30a   :  { %v1238_v18 = vadd.f32 %v1237_v24, %v2571_v51  ;;  %v1239_v53 = vpop.f32.mrb[61].mxu1 }
 0x30b   :  { %v1240_v19 = vadd.f32 %v1239_v53, %v2574_v14 }
 0x30c   :  { %1390 = vst [vmem:[#allocation7 + $0x110] sm:$0xff] %v1238_v18 }
 0x30d   :  { %1391 = vst [vmem:[#allocation7 + $0x118] sm:$0xff] %v1240_v19  ;;  %v1243_v5 = vpop.f32.mrb[62].mxu1 }
 0x30e   :  { %v1244_v50 = vadd.f32 %v1243_v5, %v2571_v51  ;;  %v1245_v27 = vpop.f32.mrb[63].mxu1 }
 0x30f   :  { %v1246_v54 = vadd.f32 %v1245_v27, %v2574_v14 }
 0x310   :  { %1396 = vst [vmem:[#allocation7 + $0x140] sm:$0xff] %v1244_v50 }
 0x311   :  { %1397 = vst [vmem:[#allocation7 + $0x148] sm:$0xff] %v1246_v54  ;;  %v1249_v0 = vpop.f32.mrb[64].mxu1 }
 0x312   :  { %v1250_v37 = vadd.f32 %v1249_v0, %v2571_v51  ;;  %v1251_v15 = vpop.f32.mrb[65].mxu1 }
 0x313   :  { %v1252_v30 = vadd.f32 %v1251_v15, %v2574_v14 }
 0x314   :  { %1402 = vst [vmem:[#allocation7 + $0x170] sm:$0xff] %v1250_v37 }
 0x315   :  { %1403 = vst [vmem:[#allocation7 + $0x178] sm:$0xff] %v1252_v30  ;;  %v1255_v40 = vpop.f32.mrb[66].mxu1 }
 0x316   :  { %v1256_v45 = vadd.f32 %v1255_v40, %v2571_v51  ;;  %v1257_v10 = vpop.f32.mrb[67].mxu1 }
 0x317   :  { %v1258_v6 = vadd.f32 %v1257_v10, %v2574_v14 }
 0x318   :  { %1408 = vst [vmem:[#allocation7 + $0x1a0] sm:$0xff] %v1256_v45 }
 0x319   :  { %1409 = vst [vmem:[#allocation7 + $0x1a8] sm:$0xff] %v1258_v6  ;;  %v1261_v55 = vpop.f32.mrb[68].mxu1 }
 0x31a   :  { %v1262_v25 = vadd.f32 %v1261_v55, %v2571_v51  ;;  %v1263_v56 = vpop.f32.mrb[69].mxu1 }
 0x31b   :  { %v1264_v46 = vadd.f32 %v1263_v56, %v2574_v14 }
 0x31c   :  { %1414 = vst [vmem:[#allocation7 + $0x1d0] sm:$0xff] %v1262_v25 }
 0x31d   :  { %1415 = vst [vmem:[#allocation7 + $0x1d8] sm:$0xff] %v1264_v46  ;;  %v1267_v52 = vpop.f32.mrb[70].mxu1 }
 0x31e   :  { %v1268_v48 = vadd.f32 %v1267_v52, %v2571_v51  ;;  %v1269_v32 = vpop.f32.mrb[71].mxu1 }
 0x31f   :  { %v1270_v47 = vadd.f32 %v1269_v32, %v2574_v14 }
 0x320   :  { %1420 = vst [vmem:[#allocation7 + $0x200] sm:$0xff] %v1268_v48 }
 0x321   :  { %1421 = vst [vmem:[#allocation7 + $0x208] sm:$0xff] %v1270_v47  ;;  %v1273_v16 = vpop.f32.mrb[72].mxu1 }
 0x322   :  { %v1274_v58 = vadd.f32 %v1273_v16, %v2571_v51  ;;  %v1275_v29 = vpop.f32.mrb[73].mxu1 }
 0x323   :  { %v1276_v20 = vadd.f32 %v1275_v29, %v2574_v14 }
 0x324   :  { %1426 = vst [vmem:[#allocation7 + $0x230] sm:$0xff] %v1274_v58 }
 0x325   :  { %1427 = vst [vmem:[#allocation7 + $0x238] sm:$0xff] %v1276_v20  ;;  %v1279_v42 = vpop.f32.mrb[74].mxu1 }
 0x326   :  { %v1280_v1 = vadd.f32 %v1279_v42, %v2571_v51  ;;  %v1281_v8 = vpop.f32.mrb[75].mxu1 }
 0x327   :  { %v1282_v33 = vadd.f32 %v1281_v8, %v2574_v14 }
 0x328   :  { %1432 = vst [vmem:[#allocation7 + $0x260] sm:$0xff] %v1280_v1 }
 0x329   :  { %1433 = vst [vmem:[#allocation7 + $0x268] sm:$0xff] %v1282_v33  ;;  %v1285_v57 = vpop.f32.mrb[76].mxu1 }
 0x32a   :  { %v1286_v59 = vadd.f32 %v1285_v57, %v2571_v51  ;;  %v1287_v22 = vpop.f32.mrb[77].mxu1 }
 0x32b   :  { %v1288_v34 = vadd.f32 %v1287_v22, %v2574_v14 }
 0x32c   :  { %1438 = vst [vmem:[#allocation7 + $0x290] sm:$0xff] %v1286_v59 }
 0x32d   :  { %1439 = vst [vmem:[#allocation7 + $0x298] sm:$0xff] %v1288_v34  ;;  %v1291_v61 = vpop.f32.mrb[78].mxu1 }
 0x32e   :  { %v1292_v41 = vadd.f32 %v1291_v61, %v2571_v51  ;;  %v1293_v26 = vpop.f32.mrb[79].mxu1 }
 0x32f   :  { %v1294_v11 = vadd.f32 %v1293_v26, %v2574_v14 }
 0x330   :  { %1444 = vst [vmem:[#allocation7 + $0x2c0] sm:$0xff] %v1292_v41 }
 0x331   :  { %1445 = vst [vmem:[#allocation7 + $0x2c8] sm:$0xff] %v1294_v11  ;;  %v1297_v39 = vpop.f32.mrb[80].mxu1 }
 0x332   :  { %v1298_v4 = vadd.f32 %v1297_v39, %v2571_v51  ;;  %v1299_v7 = vpop.f32.mrb[81].mxu1 }
 0x333   :  { %v1300_v60 = vadd.f32 %v1299_v7, %v2574_v14 }
 0x334   :  { %1450 = vst [vmem:[#allocation7 + $0x2f0] sm:$0xff] %v1298_v4 }
 0x335   :  { %1451 = vst [vmem:[#allocation7 + $0x2f8] sm:$0xff] %v1300_v60  ;;  %v1303_v28 = vpop.f32.mrb[82].mxu1 }
 0x336   :  { %v1304_v31 = vadd.f32 %v1303_v28, %v2571_v51  ;;  %v1305_v36 = vpop.f32.mrb[83].mxu1 }
 0x337   :  { %v1306_v13 = vadd.f32 %v1305_v36, %v2574_v14 }
 0x338   :  { %1456 = vst [vmem:[#allocation7 + $0x320] sm:$0xff] %v1304_v31 }
 0x339   :  { %1457 = vst [vmem:[#allocation7 + $0x328] sm:$0xff] %v1306_v13  ;;  %v1309_v62 = vpop.f32.mrb[84].mxu1 }
 0x33a   :  { %v1310_v2 = vadd.f32 %v1309_v62, %v2571_v51  ;;  %v1311_v23 = vpop.f32.mrb[85].mxu1 }
 0x33b   :  { %v1312_v63 = vadd.f32 %v1311_v23, %v2574_v14 }
 0x33c   :  { %1462 = vst [vmem:[#allocation7 + $0x350] sm:$0xff] %v1310_v2 }
 0x33d   :  { %1463 = vst [vmem:[#allocation7 + $0x358] sm:$0xff] %v1312_v63  ;;  %v1315_v9 = vpop.f32.mrb[86].mxu1 }
 0x33e   :  { %v1316_v49 = vadd.f32 %v1315_v9, %v2571_v51  ;;  %v1317_v44 = vpop.f32.mrb[87].mxu1 }
 0x33f   :  { %v1318_v38 = vadd.f32 %v1317_v44, %v2574_v14 }
 0x340   :  { %1468 = vst [vmem:[#allocation7 + $0x380] sm:$0xff] %v1316_v49 }
 0x341   :  { %1469 = vst [vmem:[#allocation7 + $0x388] sm:$0xff] %v1318_v38  ;;  %v1321_v35 = vpop.f32.mrb[88].mxu1 }
 0x342   :  { %v1322_v43 = vadd.f32 %v1321_v35, %v2571_v51  ;;  %v1323_v12 = vpop.f32.mrb[89].mxu1 }
 0x343   :  { %v1324_v17 = vadd.f32 %v1323_v12, %v2574_v14 }
 0x344   :  { %1474 = vst [vmem:[#allocation7 + $0x3b0] sm:$0xff] %v1322_v43 }
 0x345   :  { %1475 = vst [vmem:[#allocation7 + $0x3b8] sm:$0xff] %v1324_v17  ;;  %v1327_v3 = vpop.f32.mrb[90].mxu1 }
 0x346   :  { %v1328_v21 = vadd.f32 %v1327_v3, %v2571_v51  ;;  %v1329_v24 = vpop.f32.mrb[91].mxu1 }
 0x347   :  { %v1330_v18 = vadd.f32 %v1329_v24, %v2574_v14 }
 0x348   :  { %1480 = vst [vmem:[#allocation7 + $0x3e0] sm:$0xff] %v1328_v21 }
 0x349   :  { %1481 = vst [vmem:[#allocation7 + $0x3e8] sm:$0xff] %v1330_v18  ;;  %v1333_v53 = vpop.f32.mrb[92].mxu1 }
 0x34a   :  { %v1334_v19 = vadd.f32 %v1333_v53, %v2571_v51  ;;  %v1335_v5 = vpop.f32.mrb[93].mxu1 }
 0x34b   :  { %v1336_v50 = vadd.f32 %v1335_v5, %v2574_v14 }
 0x34c   :  { %1486 = vst [vmem:[#allocation7 + $0x410] sm:$0xff] %v1334_v19 }
 0x34d   :  { %1487 = vst [vmem:[#allocation7 + $0x418] sm:$0xff] %v1336_v50  ;;  %v1339_v27 = vpop.f32.mrb[94].mxu1 }
 0x34e   :  { %v1340_v54 = vadd.f32 %v1339_v27, %v2571_v51  ;;  %v1341_v0 = vpop.f32.mrb[95].mxu1 }
 0x34f   :  { %v1342_v37 = vadd.f32 %v1341_v0, %v2574_v14 }
 0x350   :  { %1492 = vst [vmem:[#allocation7 + $0x440] sm:$0xff] %v1340_v54 }
 0x351   :  { %1493 = vst [vmem:[#allocation7 + $0x448] sm:$0xff] %v1342_v37  ;;  %v1345_v15 = vpop.f32.mrb[96].mxu1 }
 0x352   :  { %v1346_v30 = vadd.f32 %v1345_v15, %v2571_v51  ;;  %v1347_v40 = vpop.f32.mrb[97].mxu1 }
 0x353   :  { %v1348_v45 = vadd.f32 %v1347_v40, %v2574_v14 }
 0x354   :  { %1498 = vst [vmem:[#allocation7 + $0x470] sm:$0xff] %v1346_v30 }
 0x355   :  { %1499 = vst [vmem:[#allocation7 + $0x478] sm:$0xff] %v1348_v45  ;;  %v1351_v10 = vpop.f32.mrb[98].mxu1 }
 0x356   :  { %v1352_v6 = vadd.f32 %v1351_v10, %v2571_v51  ;;  %v1353_v55 = vpop.f32.mrb[99].mxu1 }
 0x357   :  { %v1354_v25 = vadd.f32 %v1353_v55, %v2574_v14 }
 0x358   :  { %1504 = vst [vmem:[#allocation7 + $0x4a0] sm:$0xf] %v1352_v6 }
 0x359   :  { %1505 = vst [vmem:[#allocation7 + $0x4a8] sm:$0xf] %v1354_v25 }
 0x35a   :  { %1809 = shalt.err (!%p1806_p6)
}
 0x35b   :  { %s1810_s22 = scalar_lea.hbm %s2800_s4, 19200 }
 0x35c   :  { %p1811_p7 = scmp.ne.s32.totalorder %s2800_s4, %s1810_s22  ;;  %p1814_p8 = scmp.lt.u32.totalorder %s1810_s22, %s2800_s4 }
 0x35e   :  { %p1816_p9 = pnand %p1814_p8, %p1811_p7 }
 0x360   :  { %1819 = shalt.err (!%p1816_p9)
}
 0x361   :  { %1517 = dma.vmem_to_hbm [thread:$0]  %s1512_s18, 19200, %s2800_s4, [#allocation4], %s1830_s0, %s1830_s0, %s1831_s13  }
 0x362   :  { %1824 = dma.done.wait [#allocation4], 19200  }
 0x363   :  { %1825 = vsyncadd [#allocation4], 4294948096 }
 0x364   :  { %1521 = vsyncpa [#allocation3], 1 }
 0x365   :  { %1522 = vsyncpa [#allocation6], 1 }
 0x366   :  { %1523 = vsyncpa [#allocation4], 1 }

</bundles_post_ra>
